<compile_context>
chip_gen: v7x
topology: tpu7x:2x2x1
jax: 0.10.0
libtpu: 0.0.40
codegen_flags: <defaults>
</compile_context>

<pallas_src>
import functools

import jax
import jax.numpy as jnp
from jax.experimental import pallas as pl
from jax.experimental.pallas import tpu as pltpu


# Model dimensions (from the PyTorch module).
K = 6                    # kernel size of every ConvTranspose2d
C1, C1P = 200, 256       # layer-1 channels (padded once to a lane multiple at init)
C2, C2P = 100, 128       # layer-2 channels
H1, H2, H3 = 6, 14, 28   # spatial size after each transposed conv
BN_EPS = 1e-5            # PyTorch BatchNorm2d default


# ---------------------------------------------------------------------------
# Fused BatchNorm2d + ReLU + matmul Pallas kernel
# ---------------------------------------------------------------------------
def _bn_relu_matmul_kernel(x_ref, g_ref, b_ref, w_ref, o_ref, *, eps):
    x = x_ref[...]                                     # (L, C) f32; same block every grid step
    mean = jnp.mean(x, axis=0, keepdims=True)          # batch stats per channel (lane axis)
    xc = x - mean
    var = jnp.mean(xc * xc, axis=0, keepdims=True)     # two-pass f32 variance
    h = jnp.maximum(xc * jax.lax.rsqrt(var + eps) * g_ref[...] + b_ref[...], 0.0)
    # bf16 operands on the MXU, f32 accumulate; store in o_ref's dtype (bf16 for layer 2).
    o_ref[...] = jnp.dot(h.astype(w_ref.dtype), w_ref[...],
                         preferred_element_type=jnp.float32).astype(o_ref.dtype)


def bn_relu_matmul(x, gamma, beta, w_bf16, *, tn=512, out_dtype=jnp.float32, eps=BN_EPS):
    """Training-mode BatchNorm2d + ReLU + (L, C) @ (C, Nout) projection, fused.

    Channels sit on the lane axis; batch stats reduce over axis 0 of the (L, C) slab.  The slab
    is held as a single VMEM-resident block (its index_map is constant) while the weight /
    output columns are tiled by `tn`.  The (tiny) stats are recomputed per column tile instead
    of being cached in scratch so the grid axis stays "parallel" and v7x's two TensorCores can
    both take tiles.
    """
    L, C = x.shape
    Cw, Ncols = w_bf16.shape
    assert C == Cw and C % 128 == 0 and Ncols % 128 == 0, (x.shape, w_bf16.shape)
    tn = min(tn, Ncols)
    while Ncols % tn:
        tn -= 128

    # TODO(synk): for very large L (batch of a few hundred and up) this should become a gridded
    # two-pass design (partial sum/sumsq accumulation over an L grid, then an apply pass); the
    # whole-L block here is sized against a 32 MiB scoped-VMEM budget so it also fits v7x.
    kern = functools.partial(_bn_relu_matmul_kernel, eps=float(eps))
    return pl.pallas_call(
        kern,
        out_shape=jax.ShapeDtypeStruct((L, Ncols), out_dtype),
        grid_spec=pltpu.PrefetchScalarGridSpec(
            num_scalar_prefetch=0,
            grid=(Ncols // tn,),
            in_specs=[pl.BlockSpec((L, C), lambda j: (0, 0)),    # resident activation slab
                      pl.BlockSpec((1, C), lambda j: (0, 0)),    # gamma
                      pl.BlockSpec((1, C), lambda j: (0, 0)),    # beta
                      pl.BlockSpec((C, tn), lambda j: (0, j))],  # weight column tile
            out_specs=pl.BlockSpec((L, tn), lambda j: (0, j)),
        ),
        compiler_params=pltpu.CompilerParams(
            dimension_semantics=("parallel",),
            vmem_limit_bytes=32 * 1024 * 1024),
    )(x.astype(jnp.float32), gamma, beta, w_bf16)


# ---------------------------------------------------------------------------
# Dense col2im (overlap-add half of the stride-2 transposed convs) — XLA glue, no scatter.
# ---------------------------------------------------------------------------
def col2im_stride2_add(t, *, pad, out_hw):
    """t[n, ih, iw, kh, kw, ...] is accumulated at output pixel (2*ih - pad + kh, 2*iw - pad + kw).

    Stride 2, kernel 6: every output pixel of phase (oh%2, ow%2) receives exactly 9 addends, so
    the accumulation is 9 static shifted dense adds into a (N, A, 2, B, 2, ...) phase slab —
    fully vectorized elementwise XLA, no scatter.  Accumulation is done in f32 (inputs may be
    bf16 from the matmul store).
    """
    # TODO(synk): this overlap-add plus the final tanh stay as dense fused XLA glue; a Pallas
    # version would need in-kernel strided accumulation and is not worth it at these sizes.
    N, IH, IW, k = t.shape[:4]
    assert k == 6 and t.shape[4] == 6, t.shape
    trail = t.shape[5:]
    A, B = IH + 2, IW + 2                      # canvas = (2A, 2B) = out_hw + 2*pad
    assert 2 * A == out_hw + 2 * pad and 2 * B == out_hw + 2 * pad

    tpad = jnp.pad(t, ((0, 0), (2, 2), (2, 2), (0, 0), (0, 0)) + ((0, 0),) * len(trail))
    acc = None
    for r in range(3):
        for c in range(3):
            term = tpad[:, 2 - r:2 - r + A, 2 - c:2 - c + B,
                        2 * r:2 * r + 2, 2 * c:2 * c + 2].astype(jnp.float32)
            acc = term if acc is None else acc + term
    # acc[n, a, b, ph, pw, ...] -> canvas[n, 2a+ph, 2b+pw, ...]
    perm = (0, 1, 3, 2, 4) + tuple(range(5, 5 + len(trail)))
    canvas = jnp.transpose(acc, perm).reshape((N, 2 * A, 2 * B) + trail)
    return canvas[:, pad:pad + out_hw, pad:pad + out_hw]


# ---------------------------------------------------------------------------
# Parameters (weight reshuffle / padding / bf16 cast done ONCE here, not per forward)
# ---------------------------------------------------------------------------
def prepare_params(W1, g1, b1, W2, g2, b2, W3):
    # Layer 1: out[n, (h, w), c] = z[n] * w1m[(h, w), c];  channels padded 200 -> 256 lanes.
    w1m = jnp.transpose(W1[0], (1, 2, 0)).reshape(K * K, C1)              # (36, 200)
    w1m = jnp.pad(w1m, ((0, 0), (0, C1P - C1)))                           # (36, 256) f32
    g1p = jnp.pad(g1, (0, C1P - C1)).reshape(1, C1P)
    b1p = jnp.pad(b1, (0, C1P - C1)).reshape(1, C1P)

    # Layer 2 in scatter form (no spatial flip needed): columns ordered (kh, kw, co),
    # co padded 100 -> 128 so the col2im result is already lane-aligned.
    w2m = jnp.transpose(W2, (0, 2, 3, 1))                                 # (200, 6, 6, 100)
    w2m = jnp.pad(w2m, ((0, C1P - C1), (0, 0), (0, 0), (0, C2P - C2)))    # (256, 6, 6, 128)
    w2m = w2m.reshape(C1P, K * K * C2P).astype(jnp.bfloat16)              # (256, 4608) bf16
    g2p = jnp.pad(g2, (0, C2P - C2)).reshape(1, C2P)
    b2p = jnp.pad(b2, (0, C2P - C2)).reshape(1, C2P)

    # Layer 3 (Cout = 1): a (Cin, k*k) projection, zero-padded to (128, 128) for lane alignment.
    w3m = W3[:, 0].reshape(C2, K * K)                                     # (100, 36)
    w3m = jnp.pad(w3m, ((0, C2P - C2), (0, 128 - K * K))).astype(jnp.bfloat16)
    return (w1m, g1p, b1p, w2m, g2p, b2p, w3m)


def init_raw_params(key):
    k1, k2, k3 = jax.random.split(key, 3)
    # PyTorch ConvTranspose2d weight layout: (in_channels, out_channels, kH, kW), bias=False.
    W1 = 0.02 * jax.random.normal(k1, (1, C1, K, K), jnp.float32)
    W2 = 0.02 * jax.random.normal(k2, (C1, C2, K, K), jnp.float32)
    W3 = 0.02 * jax.random.normal(k3, (C2, 1, K, K), jnp.float32)
    # BatchNorm2d defaults: weight = 1, bias = 0.
    g1, b1 = jnp.ones((C1,), jnp.float32), jnp.zeros((C1,), jnp.float32)
    g2, b2 = jnp.ones((C2,), jnp.float32), jnp.zeros((C2,), jnp.float32)
    return W1, g1, b1, W2, g2, b2, W3


# ---------------------------------------------------------------------------
# Generator forward (training-mode BatchNorm, matching the PyTorch module's default state)
# ---------------------------------------------------------------------------
def generator_forward(z, params):
    w1m, g1p, b1p, w2m, g2p, b2p, w3m = params
    N = z.shape[0]

    # Layer 1: ConvTranspose2d(1, 200, 6, 1, 0) on a 1x1 input == outer product z[n] * W1.
    # TODO(synk): this broadcast-multiply is left to XLA (fuses into the producer of x1) so the
    # Pallas kernels stay 2-D; fusing it in-kernel would need an (N, 36, C) -> (N*36, C) relayout.
    zf = z.reshape(N, 1, 1).astype(jnp.float32)
    x1 = (zf * w1m[None]).reshape(N * K * K, C1P)                     # (N*36, 256) f32

    # BN1(200) + ReLU fused with the layer-2 matmul (ConvTranspose2d(200, 100, 6, 2, 1) in
    # scatter form).  bf16 output halves the dominant HBM writeback; upcast in the overlap-add.
    t2 = bn_relu_matmul(x1, g1p, b1p, w2m, tn=512, out_dtype=jnp.bfloat16)   # (N*36, 4608)
    t2 = t2.reshape(N, H1, H1, K, K, C2P)
    x2 = col2im_stride2_add(t2, pad=1, out_hw=H2)                     # (N, 14, 14, 128) f32
    x2 = x2.reshape(N * H2 * H2, C2P)

    # BN2(100) + ReLU fused with the layer-3 projection (ConvTranspose2d(100, 1, 6, 2, 2)).
    t3 = bn_relu_matmul(x2, g2p, b2p, w3m, tn=128, out_dtype=jnp.float32)    # (N*196, 128)
    t3 = t3[:, :K * K].reshape(N, H2, H2, K, K)                       # Cout=1 axis squeezed
    y = col2im_stride2_add(t3, pad=2, out_hw=H3)                      # (N, 28, 28) f32

    # Tanh folded into the XLA overlap-add epilogue (a separate pallas_call is pure dispatch).
    return jnp.tanh(y).reshape(N, 1, H3, H3)


# ---------------------------------------------------------------------------
# Pure-JAX f32 reference of the PyTorch forward (for validation)
# ---------------------------------------------------------------------------
def reference_forward(z, W1, g1, b1, W2, g2, b2, W3):
    def convT(x, W, stride, pad):
        kk = W.shape[-1]
        return jax.lax.conv_general_dilated(
            x, jnp.flip(W, (2, 3)), window_strides=(1, 1),
            padding=[(kk - 1 - pad, kk - 1 - pad)] * 2,
            lhs_dilation=(stride, stride),
            dimension_numbers=('NCHW', 'IOHW', 'NCHW'))

    def bn_relu(x, g, b):
        m = jnp.mean(x, axis=(0, 2, 3), keepdims=True)
        v = jnp.mean((x - m) ** 2, axis=(0, 2, 3), keepdims=True)
        y = (x - m) * jax.lax.rsqrt(v + BN_EPS) * g.reshape(1, -1, 1, 1) + b.reshape(1, -1, 1, 1)
        return jnp.maximum(y, 0.0)

    x = bn_relu(convT(z, W1, 1, 0), g1, b1)
    x = bn_relu(convT(x, W2, 2, 1), g2, b2)
    x = convT(x, W3, 2, 2)
    return jnp.tanh(x)                                                 # (N, 1, 28, 28)


if __name__ == "__main__":
    key = jax.random.PRNGKey(0)
    pkey, zkey = jax.random.split(key)
    raw = init_raw_params(pkey)
    params = prepare_params(*raw)

    # Latent input: (batch, 1, 1, 1) — the spatial arithmetic of the three transposed convs
    # requires a 1x1 input to land on the 28x28 image that forward() views as (N, 1, 28, 28).
    batch = 2
    z = jax.random.normal(zkey, (batch, 1, 1, 1), jnp.float32)

    fwd = jax.jit(generator_forward)
    img = jax.block_until_ready(fwd(z, params))

    assert img.shape == (batch, 1, 28, 28), img.shape
    assert bool(jnp.all(jnp.isfinite(img)))
    assert bool(jnp.max(jnp.abs(img)) <= 1.0)      # tanh range

    # Validate against the f32 reference (loose tolerance: matmul operands and the layer-2
    # activations go through bf16 on the MXU path).
    ref = jax.jit(reference_forward)(z, *raw)
    err = float(jnp.max(jnp.abs(img - ref)))
    assert err < 5e-2, f"max |kernel - reference| = {err}"
    print("KERNEL_OK")
</pallas_src>

<mosaic_0001>
module attributes {stable_mosaic.version = 11 : i64} {
  func.func @_bn_relu_matmul_kernel(%arg0: i32, %arg1: memref<72x256xf32, #tpu.memory_space<vmem>>, %arg2: memref<1x256xf32, #tpu.memory_space<vmem>>, %arg3: memref<1x256xf32, #tpu.memory_space<vmem>>, %arg4: memref<256x512xbf16, #tpu.memory_space<vmem>>, %arg5: memref<72x512xbf16, #tpu.memory_space<vmem>>) attributes {dimension_semantics = [#tpu.dimension_semantics<parallel>], iteration_bounds = array<i64: 9>, scalar_prefetch = 0 : i64, scratch_operands = 0 : i64, tpu.core_type = #tpu.core_type<tc>, window_params = [{pipeline_mode = #tpu.pipeline_mode<synchronous>, transform_indices = @transform_0, window_bounds = array<i64: 72, 256>}, {pipeline_mode = #tpu.pipeline_mode<synchronous>, transform_indices = @transform_1, window_bounds = array<i64: 1, 256>}, {pipeline_mode = #tpu.pipeline_mode<synchronous>, transform_indices = @transform_2, window_bounds = array<i64: 1, 256>}, {transform_indices = @transform_3, window_bounds = array<i64: 256, 512>}, {transform_indices = @transform_4, window_bounds = array<i64: 72, 512>}]} {
    %c0 = arith.constant 0 : index
    %c0_0 = arith.constant 0 : index
    %0 = vector.load %arg1[%c0, %c0_0] : memref<72x256xf32, #tpu.memory_space<vmem>>, vector<72x256xf32>
    %cst = arith.constant dense<0.000000e+00> : vector<256xf32>
    %1 = vector.multi_reduction <add>, %0, %cst [0] : vector<72x256xf32> to vector<256xf32>
    %2 = vector.shape_cast %1 : vector<256xf32> to vector<1x256xf32>
    %cst_1 = arith.constant 7.200000e+01 : f32
    %3 = vector.broadcast %cst_1 : f32 to vector<1x256xf32>
    %4 = arith.divf %2, %3 : vector<1x256xf32>
    %5 = vector.broadcast %4 : vector<1x256xf32> to vector<72x256xf32>
    %6 = arith.subf %0, %5 : vector<72x256xf32>
    %7 = arith.mulf %6, %6 : vector<72x256xf32>
    %cst_2 = arith.constant dense<0.000000e+00> : vector<256xf32>
    %8 = vector.multi_reduction <add>, %7, %cst_2 [0] : vector<72x256xf32> to vector<256xf32>
    %9 = vector.shape_cast %8 : vector<256xf32> to vector<1x256xf32>
    %cst_3 = arith.constant 7.200000e+01 : f32
    %10 = vector.broadcast %cst_3 : f32 to vector<1x256xf32>
    %11 = arith.divf %9, %10 : vector<1x256xf32>
    %cst_4 = arith.constant 9.99999974E-6 : f32
    %12 = vector.broadcast %cst_4 : f32 to vector<1x256xf32>
    %13 = arith.addf %11, %12 : vector<1x256xf32>
    %14 = math.rsqrt %13 : vector<1x256xf32>
    %15 = vector.broadcast %14 : vector<1x256xf32> to vector<72x256xf32>
    %16 = arith.mulf %6, %15 : vector<72x256xf32>
    %c0_5 = arith.constant 0 : index
    %c0_6 = arith.constant 0 : index
    %17 = vector.load %arg2[%c0_5, %c0_6] : memref<1x256xf32, #tpu.memory_space<vmem>>, vector<1x256xf32>
    %18 = vector.broadcast %17 : vector<1x256xf32> to vector<72x256xf32>
    %19 = arith.mulf %16, %18 : vector<72x256xf32>
    %c0_7 = arith.constant 0 : index
    %c0_8 = arith.constant 0 : index
    %20 = vector.load %arg3[%c0_7, %c0_8] : memref<1x256xf32, #tpu.memory_space<vmem>>, vector<1x256xf32>
    %21 = vector.broadcast %20 : vector<1x256xf32> to vector<72x256xf32>
    %22 = arith.addf %19, %21 : vector<72x256xf32>
    %cst_9 = arith.constant 0.000000e+00 : f32
    %23 = vector.broadcast %cst_9 : f32 to vector<72x256xf32>
    %24 = arith.maximumf %22, %23 : vector<72x256xf32>
    %25 = arith.truncf %24 : vector<72x256xf32> to vector<72x256xbf16>
    %c0_10 = arith.constant 0 : index
    %c0_11 = arith.constant 0 : index
    %26 = vector.load %arg4[%c0_10, %c0_11] : memref<256x512xbf16, #tpu.memory_space<vmem>>, vector<256x512xbf16>
    %cst_12 = arith.constant dense<0.000000e+00> : vector<72x512xf32>
    %27 = tpu.matmul %25, %26, %cst_12 {dimension_numbers = #tpu.dot_dimension_numbers<[1], [0], [0], [1], [0, 0, 1, 1], [], []>} : vector<72x256xbf16>, vector<256x512xbf16>, vector<72x512xf32> -> vector<72x512xf32>
    %28 = arith.truncf %27 : vector<72x512xf32> to vector<72x512xbf16>
    %c0_13 = arith.constant 0 : index
    %c0_14 = arith.constant 0 : index
    %29 = vector.load %arg5[%c0_13, %c0_14] : memref<72x512xbf16, #tpu.memory_space<vmem>>, vector<72x512xbf16>
    tpu.vector_store %arg5[%c0_13, %c0_14], %28 {strides = array<i32>} : memref<72x512xbf16, #tpu.memory_space<vmem>>, vector<72x512xbf16>,
    return
  }
  func.func @transform_0(%arg0: i32) -> (i32, i32) {
    %c0_i32 = arith.constant 0 : i32
    %c0_i32_0 = arith.constant 0 : i32
    %c0_i32_1 = arith.constant 0 : i32
    return %c0_i32, %c0_i32_0 : i32, i32
  }
  func.func @transform_1(%arg0: i32) -> (i32, i32) {
    %c0_i32 = arith.constant 0 : i32
    %c0_i32_0 = arith.constant 0 : i32
    %c0_i32_1 = arith.constant 0 : i32
    return %c0_i32, %c0_i32_0 : i32, i32
  }
  func.func @transform_2(%arg0: i32) -> (i32, i32) {
    %c0_i32 = arith.constant 0 : i32
    %c0_i32_0 = arith.constant 0 : i32
    %c0_i32_1 = arith.constant 0 : i32
    return %c0_i32, %c0_i32_0 : i32, i32
  }
  func.func @transform_3(%arg0: i32) -> (i32, i32) {
    %c0_i32 = arith.constant 0 : i32
    %c0_i32_0 = arith.constant 0 : i32
    return %c0_i32, %arg0 : i32, i32
  }
  func.func @transform_4(%arg0: i32) -> (i32, i32) {
    %c0_i32 = arith.constant 0 : i32
    %c0_i32_0 = arith.constant 0 : i32
    return %c0_i32, %arg0 : i32, i32
  }
}

module attributes {stable_mosaic.version = 11 : i64} {
  func.func @_bn_relu_matmul_kernel(%arg0: i32, %arg1: memref<392x128xf32, #tpu.memory_space<vmem>>, %arg2: memref<1x128xf32, #tpu.memory_space<vmem>>, %arg3: memref<1x128xf32, #tpu.memory_space<vmem>>, %arg4: memref<128x128xbf16, #tpu.memory_space<vmem>>, %arg5: memref<392x128xf32, #tpu.memory_space<vmem>>) attributes {dimension_semantics = [#tpu.dimension_semantics<parallel>], iteration_bounds = array<i64: 1>, scalar_prefetch = 0 : i64, scratch_operands = 0 : i64, tpu.core_type = #tpu.core_type<tc>, window_params = [{pipeline_mode = #tpu.pipeline_mode<synchronous>, transform_indices = @transform_0, window_bounds = array<i64: 392, 128>}, {pipeline_mode = #tpu.pipeline_mode<synchronous>, transform_indices = @transform_1, window_bounds = array<i64: 1, 128>}, {pipeline_mode = #tpu.pipeline_mode<synchronous>, transform_indices = @transform_2, window_bounds = array<i64: 1, 128>}, {transform_indices = @transform_3, window_bounds = array<i64: 128, 128>}, {transform_indices = @transform_4, window_bounds = array<i64: 392, 128>}]} {
    %c0 = arith.constant 0 : index
    %c0_0 = arith.constant 0 : index
    %0 = vector.load %arg1[%c0, %c0_0] : memref<392x128xf32, #tpu.memory_space<vmem>>, vector<392x128xf32>
    %cst = arith.constant dense<0.000000e+00> : vector<128xf32>
    %1 = vector.multi_reduction <add>, %0, %cst [0] : vector<392x128xf32> to vector<128xf32>
    %2 = vector.shape_cast %1 : vector<128xf32> to vector<1x128xf32>
    %cst_1 = arith.constant 3.920000e+02 : f32
    %3 = vector.broadcast %cst_1 : f32 to vector<1x128xf32>
    %4 = arith.divf %2, %3 : vector<1x128xf32>
    %5 = vector.broadcast %4 : vector<1x128xf32> to vector<392x128xf32>
    %6 = arith.subf %0, %5 : vector<392x128xf32>
    %7 = arith.mulf %6, %6 : vector<392x128xf32>
    %cst_2 = arith.constant dense<0.000000e+00> : vector<128xf32>
    %8 = vector.multi_reduction <add>, %7, %cst_2 [0] : vector<392x128xf32> to vector<128xf32>
    %9 = vector.shape_cast %8 : vector<128xf32> to vector<1x128xf32>
    %cst_3 = arith.constant 3.920000e+02 : f32
    %10 = vector.broadcast %cst_3 : f32 to vector<1x128xf32>
    %11 = arith.divf %9, %10 : vector<1x128xf32>
    %cst_4 = arith.constant 9.99999974E-6 : f32
    %12 = vector.broadcast %cst_4 : f32 to vector<1x128xf32>
    %13 = arith.addf %11, %12 : vector<1x128xf32>
    %14 = math.rsqrt %13 : vector<1x128xf32>
    %15 = vector.broadcast %14 : vector<1x128xf32> to vector<392x128xf32>
    %16 = arith.mulf %6, %15 : vector<392x128xf32>
    %c0_5 = arith.constant 0 : index
    %c0_6 = arith.constant 0 : index
    %17 = vector.load %arg2[%c0_5, %c0_6] : memref<1x128xf32, #tpu.memory_space<vmem>>, vector<1x128xf32>
    %18 = vector.broadcast %17 : vector<1x128xf32> to vector<392x128xf32>
    %19 = arith.mulf %16, %18 : vector<392x128xf32>
    %c0_7 = arith.constant 0 : index
    %c0_8 = arith.constant 0 : index
    %20 = vector.load %arg3[%c0_7, %c0_8] : memref<1x128xf32, #tpu.memory_space<vmem>>, vector<1x128xf32>
    %21 = vector.broadcast %20 : vector<1x128xf32> to vector<392x128xf32>
    %22 = arith.addf %19, %21 : vector<392x128xf32>
    %cst_9 = arith.constant 0.000000e+00 : f32
    %23 = vector.broadcast %cst_9 : f32 to vector<392x128xf32>
    %24 = arith.maximumf %22, %23 : vector<392x128xf32>
    %25 = arith.truncf %24 : vector<392x128xf32> to vector<392x128xbf16>
    %c0_10 = arith.constant 0 : index
    %c0_11 = arith.constant 0 : index
    %26 = vector.load %arg4[%c0_10, %c0_11] : memref<128x128xbf16, #tpu.memory_space<vmem>>, vector<128x128xbf16>
    %cst_12 = arith.constant dense<0.000000e+00> : vector<392x128xf32>
    %27 = tpu.matmul %25, %26, %cst_12 {dimension_numbers = #tpu.dot_dimension_numbers<[1], [0], [0], [1], [0, 0, 1, 1], [], []>} : vector<392x128xbf16>, vector<128x128xbf16>, vector<392x128xf32> -> vector<392x128xf32>
    %c0_13 = arith.constant 0 : index
    %c0_14 = arith.constant 0 : index
    %28 = vector.load %arg5[%c0_13, %c0_14] : memref<392x128xf32, #tpu.memory_space<vmem>>, vector<392x128xf32>
    tpu.vector_store %arg5[%c0_13, %c0_14], %27 {strides = array<i32>} : memref<392x128xf32, #tpu.memory_space<vmem>>, vector<392x128xf32>,
    return
  }
  func.func @transform_0(%arg0: i32) -> (i32, i32) {
    %c0_i32 = arith.constant 0 : i32
    %c0_i32_0 = arith.constant 0 : i32
    %c0_i32_1 = arith.constant 0 : i32
    return %c0_i32, %c0_i32_0 : i32, i32
  }
  func.func @transform_1(%arg0: i32) -> (i32, i32) {
    %c0_i32 = arith.constant 0 : i32
    %c0_i32_0 = arith.constant 0 : i32
    %c0_i32_1 = arith.constant 0 : i32
    return %c0_i32, %c0_i32_0 : i32, i32
  }
  func.func @transform_2(%arg0: i32) -> (i32, i32) {
    %c0_i32 = arith.constant 0 : i32
    %c0_i32_0 = arith.constant 0 : i32
    %c0_i32_1 = arith.constant 0 : i32
    return %c0_i32, %c0_i32_0 : i32, i32
  }
  func.func @transform_3(%arg0: i32) -> (i32, i32) {
    %c0_i32 = arith.constant 0 : i32
    %c0_i32_0 = arith.constant 0 : i32
    return %c0_i32, %arg0 : i32, i32
  }
  func.func @transform_4(%arg0: i32) -> (i32, i32) {
    %c0_i32 = arith.constant 0 : i32
    %c0_i32_0 = arith.constant 0 : i32
    return %c0_i32, %arg0 : i32, i32
  }
}

</mosaic_0001>

<bundles_post_ra>
// kernel: generator_forward.2
= control target key start
LH: loop header
LB: loop body
LE: loop exit
PB: predicated region body
PF: predicated region fallthrough
CT: control target
= control target key end

     0   :  { %9 = vsyncpa [#allocation3], 0  ;;  %s2324_s0 = inlined_call_operand.vmem [shape: f32[72,256], index: 0, kind: input, shape index: {}]   ;;  %s2325_s1 = inlined_call_operand.hbm [shape: f32[1,256], index: 1, kind: input, shape index: {}]   ;;  %s2326_s2 = inlined_call_operand.hbm [shape: f32[1,256], index: 2, kind: input, shape index: {}]   ;;  %s2327_s3 = inlined_call_operand.hbm [shape: bf16[256,4608], index: 3, kind: input, shape index: {}]   ;;  %s2328_s4 = inlined_call_operand.vmem [shape: bf16[72,4608], index: 4, kind: output, shape index: {}]  }
   0x1   :  { %10 = vsyncpa [#allocation5], 0  ;;  %s1723_s15 = smov 0   ;;  %s1725_s16 = smov 0  }
   0x2   :  { %s1727_s17 = smov 0   ;;  %s1729_s18 = smov 0  }
   0x3 LB: > { %s1742_s19 = sadd.s32 4294967295, %s1690_s18   ;;  %s1745_s20 = sadd.s32 1, %s1690_s18   ;;  %s1690_s18 = sphi %s1729_s18, %s2350_s18   ;;  %s1686_s17 = sphi %s1727_s17, %s2349_s17   ;;  %s1682_s16 = sphi %s1725_s16, %s2348_s16   ;;  %s1678_s15 = sphi %s1723_s15, %s2347_s15  }
   0x4   : > { %s83_s21 = ssub.s32 %s1690_s18, %s1745_s20  ;;  %s86_s22 = sadd.s32 1, %s1686_s17 }
   0x5   : > { %p84_p0 = scmp.eq.s32.totalorder %s83_s21, 0  ;;  %p93_p1 = scmp.ne.s32.totalorder %s1686_s17, %s1682_s16 }
   0x6   : > { %p94_p2 = scmp.eq.s32.totalorder %s1690_s18, 0  ;;  %p99_p3 = scmp.ne.s32.totalorder %s1682_s16, %s1678_s15 }
   0x7   : > { %s1755_s23 = scalar_select %p84_p0, %s1686_s17, %s86_s22  }
   0x8   : > { %p1757_p4 = por %p94_p2, %p93_p1  ;;  %p2329_p5 = scmp.eq.s32.totalorder %s1742_s19, 0 }
   0x9   : > { %p123_p6 = scmp.eq.s32.totalorder %s1742_s19, 8  ;;  %p1281_p7 = scmp.ge.s32.totalorder %s1690_s18, 1 }
   0xa   : > { %p1766_p8 = por %p2329_p5, %p99_p3  ;;  %p136_p9 = scmp.lt.s32.totalorder %s1690_s18, 10 }
   0xb   : > { %p1771_p10 = por %p123_p6, %p93_p1  ;;  %s1692_s28 = smov [#allocation2]  }
   0xc   : > { %s2334_s25 = scalar_select %p1766_p8, 1, 0 }
   0xd   : > { %s2335_s26 = scalar_select %p1771_p10, 1, 0 }
   0xe   : > { %p1775_p11 = pnand %p1281_p7, %p136_p9  ;;  %s152_s29 = sshll.u32 %s1692_s28, 4  ;;  %s153_s29 = int_to_ptr.vmem [resolvable:$true] %s152_s29 }
   0xf   : > { %p1422_p13 = scmp.lt.s32.totalorder %s1690_s18, 9  ;;  %s1693_s5 = smov [#allocation4]  }
  0x10   : > { %s2336_s27 = scalar_select %p1775_p11, 1, 0 }
  0x11   : > { %p1409_p12 = pneg %p1775_p11  ;;  %s163_s6 = sshll.u32 %s1693_s5, 4  ;;  %s1794_s6 = int_to_ptr.vmem [resolvable:$true] %s163_s6 }
  0x12   : > { %p1790_p1 = pnand %p1422_p13, %p1757_p4  ;;  %s174_s8 = sand.u32 1, %s1690_s18  }
  0x13   : > { %p1784_p0 = pnand %p1409_p12, %p2329_p5  ;;  %s1562_s11 = scalar_lea.hbm %s2325_s1, 32 }
  0x14   : > { %s2338_s7 = scalar_select %p1790_p1, 1, 0 }
  0x15   : > { %p1563_p2 = scmp.ne.s32.totalorder %s2325_s1, %s1562_s11  ;;  %p1564_p3 = pneg %p1784_p0 }
  0x16   : > { %p1569_p7 = scmp.lt.u32.totalorder %s1562_s11, %s2325_s1 }
  0x17   : > { %p1565_p6 = pnand %p1564_p3, %p1563_p2 }
  0x19   : > { %p1566_p4 = pneg %p1565_p6 }
  0x1b   : > { %p1571_p9 = pnand %p1569_p7, %p1566_p4 }
  0x1d   : > { %1574 = shalt.err (!%p1571_p9)
}
  0x1e   : > { %s1575_s21 = scalar_lea.vmem %s153_s29, 32  ;;  %p1583_p10 = scmp.lt.s32.totalorder %s153_s29, %s153_s29 }
  0x1f   : > { %p1576_p12 = scmp.ne.s32.totalorder %s153_s29, %s1575_s21  ;;  %p1584_p8 = scmp.lt.s32.totalorder %s1575_s21, %s1575_s21 }
  0x21   : > { %p1578_p13 = pnand %p1576_p12, %p1564_p3  ;;  %p1585_p11 = por %p1584_p8, %p1583_p10 }
  0x23   : > { %p1579_p5 = pneg %p1578_p13 }
  0x25   : > { %p1586_p1 = pnand %p1585_p11, %p1579_p5 }
  0x27   : > { %1589 = shalt.err (!%p1586_p1)
}
  0x28   : > { %1412 = dma.hbm_to_vmem [thread:$0]  (!%p1784_p0), %s2325_s1, 32, %s153_s29, [#allocation3]  }
  0x29   : > { %s1590_s9 = scalar_lea.hbm %s2326_s2, 32 }
  0x2a   : > { %p1591_p2 = scmp.ne.s32.totalorder %s2326_s2, %s1590_s9  ;;  %p1597_p10 = scmp.lt.u32.totalorder %s1590_s9, %s2326_s2 }
  0x2c   : > { %p1593_p8 = pnand %p1591_p2, %p1564_p3 }
  0x2e   : > { %p1594_p5 = pneg %p1593_p8 }
  0x30   : > { %p1599_p11 = pnand %p1597_p10, %p1594_p5 }
  0x32   : > { %1602 = shalt.err (!%p1599_p11)
}
  0x33   : > { %s1603_s29 = scalar_lea.vmem %s1794_s6, 32  ;;  %p1611_p7 = scmp.lt.s32.totalorder %s1794_s6, %s1794_s6 }
  0x34   : > { %p1604_p1 = scmp.ne.s32.totalorder %s1794_s6, %s1603_s29  ;;  %p1612_p9 = scmp.lt.s32.totalorder %s1603_s29, %s1603_s29 }
  0x36   : > { %p1606_p6 = pnand %p1604_p1, %p1564_p3  ;;  %p1613_p12 = por %p1612_p9, %p1611_p7 }
  0x38   : > { %p1607_p4 = pneg %p1606_p6 }
  0x3a   : > { %p1614_p13 = pnand %p1613_p12, %p1607_p4 }
  0x3c   : > { %1617 = shalt.err (!%p1614_p13)
}
  0x3d   : > { %1415 = dma.hbm_to_vmem [thread:$0]  (!%p1784_p0), %s2326_s2, 32, %s1794_s6, [#allocation5]  }
  0x3e   : > { %s176_s21 = sand.u32 1, %s1686_s17   ;;  %s1378_s22 = sshll.u32 %s1690_s18, 8 }
  0x3f   : > { %s1285_s24 = sshll.u32 %s176_s21, 9  ;;  %s1849_s9 = scalar_lea.hbm %s2327_s3, %s1378_s22 }
  0x40   : > { %s178_s30 = scalar_lea.vmem [#allocation6], %s1285_s24  ;;  %s1855_s11 = scalar_lea.sflag [#allocation3], %s174_s8 }
  0x41   : > { %s185_s10 = sshll.u32 %s178_s30, 4  ;;  %s1618_s6 = scalar_lea.hbm %s1849_s9, 8192  ;;  %s1851_s10 = int_to_ptr.vmem [resolvable:$true] %s185_s10 }
  0x42   : > { %p1619_p0 = scmp.ne.s32.totalorder %s1849_s9, %s1618_s6  ;;  %p2339_p3 = scmp.ne.s32.totalorder %s2338_s7, 0 }
  0x43   : > { %s1623_s29 = scalar_lea.hbm %s2327_s3, 73728  ;;  %p1624_p10 = scmp.lt.u32.totalorder %s1849_s9, %s2327_s3 }
  0x44   : > { %p1620_p2 = pneg %p2339_p3  ;;  %p1625_p11 = scmp.lt.u32.totalorder %s1623_s29, %s1618_s6 }
  0x45   : > { %p1627_p6 = scmp.lt.u32.totalorder %s1618_s6, %s1849_s9 }
  0x46   : > { %p1621_p8 = pnand %p1620_p2, %p1619_p0  ;;  %p1626_p1 = por %p1625_p11, %p1624_p10 }
  0x48   : > { %p1622_p5 = pneg %p1621_p8  ;;  %p1628_p4 = por %p1627_p6, %p1626_p1 }
  0x4a   : > { %p1629_p7 = pnand %p1628_p4, %p1622_p5 }
  0x4c   : > { %1632 = shalt.err (!%p1629_p7)
}
  0x4d   : > { %s1633_s18 = scalar_lea.vmem %s1851_s10, 8192  ;;  %s1694_s8 = smov [#allocation6]  }
  0x4e   : > { %p1634_p9 = scmp.ne.s32.totalorder %s1851_s10, %s1633_s18  ;;  %s1638_s21 = sshll.u32 %s1694_s8, 4  ;;  %s1639_s21 = int_to_ptr.vmem [resolvable:$false] %s1638_s21 }
  0x4f   : > { %s1640_s22 = scalar_lea.vmem %s1639_s21, 16384  ;;  %p1641_p0 = scmp.lt.s32.totalorder %s1851_s10, %s1639_s21 }
  0x50   : > { %p1636_p12 = pnand %p1634_p9, %p1620_p2  ;;  %p1642_p8 = scmp.lt.s32.totalorder %s1640_s22, %s1633_s18 }
  0x52   : > { %p1637_p13 = pneg %p1636_p12  ;;  %p1643_p10 = por %p1642_p8, %p1641_p0 }
  0x54   : > { %p1644_p11 = pnand %p1643_p10, %p1637_p13 }
  0x56   : > { %1647 = shalt.err (!%p1644_p11)
}
  0x57   : > { %s1695_s24 = smov 2304   ;;  %s1696_s28 = smov 256  }
  0x58   : > { %s1697_s5 = smov 16   ;;  %p2340_p2 = scmp.ne.s32.totalorder %s2336_s27, 0 }
  0x59   : > { %1419 = dma.hbm_to_vmem [thread:$0]  (!%p2339_p3), %s1849_s9, 8192, %s1851_s10, %s1855_s11, %s1695_s24, %s1696_s28, %s1697_s5  }
  0x5a   : > { %197 = sbr.rel (%p2340_p2) target bundleno = 473 (0x1d9), region = 36  ;;  %p2341_p5 = scmp.eq.s32.totalorder (!%p2340_p2), %s1742_s19, 0 }
  0x61   : > { %1665 = dma.done.wait (%p2341_p5), [#allocation3], 32   ;;  %p2342_p1 = pmov %p2341_p5 }
  0x63   : > { %1667 = vsyncadd (%p2342_p1), [#allocation3], 4294967264  ;;  %p2343_p6 = pmov %p2342_p1 }
  0x64   : > { %p2344_p4 = pmov %p2342_p1 }
  0x65   : > { %1669 = dma.done.wait (%p2343_p6), [#allocation5], 32  }
  0x66   : > { %1671 = vsyncadd (%p2344_p4), [#allocation5], 4294967264  ;;  %s207_s7 = sand.u32 1, %s1742_s19   ;;  %s209_s9 = sand.u32 1, %s1682_s16  }
  0x67   : > { %s1291_s27 = sshll.u32 %s209_s9, 9  ;;  %s208_s30 = scalar_lea.sflag [#allocation3], %s207_s7 }
  0x68   : > { %s1897_s10 = scalar_lea.vmem [#allocation6], %s1291_s27  ;;  %p2345_p3 = scmp.ne.s32.totalorder %s2334_s25, 0 }
  0x6a   : > { %1673 = dma.done.wait (%p2345_p3), %s208_s30, 8192  }
  0x6b   : > { %1675 = vsyncadd (%p2345_p3), %s208_s30, 4294959104  ;;  %v1462_v0 = vld [vmem:[%s1897_s10 + $0x4] ss:$16 sps:$4 sm:$0xff]   ;;  %v1464_v1 = vld [vmem:[%s1897_s10 + $0xc] ss:$16 sps:$4 sm:$0xff]   ;;  %p2346_p7 = scmp.ne.s32.totalorder %s2335_s26, 0 }
  0x6c   : > { %846 = vmatprep.subr.bf16.mxu0 %v1462_v0  ;;  %v1466_v2 = vld [vmem:[%s1897_s10] ss:$16 sps:$4 sm:$0xff]   ;;  %v1467_v3 = vld [vmem:[%s1897_s10 + $0x8] ss:$16 sps:$4 sm:$0xff]   ;;  %927 = vmatprep.subr.bf16.mxu1 %v1464_v1  ;;  %v1468_v4 = vld [vmem:[%s1897_s10 + $0x24] ss:$16 sps:$4 sm:$0xff]  }
  0x6d   : > { %847 = vmatpush1.bf16.msra.mxu0 %v1466_v2  ;;  %928 = vmatpush1.bf16.msra.mxu1 %v1467_v3  ;;  %v1470_v5 = vld [vmem:[%s1897_s10 + $0x2c] ss:$16 sps:$4 sm:$0xff]   ;;  %v1472_v6 = vld [vmem:[%s1897_s10 + $0x20] ss:$16 sps:$4 sm:$0xff]   ;;  %v1473_v7 = vld [vmem:[%s1897_s10 + $0x28] ss:$16 sps:$4 sm:$0xff]  }
  0x6e   : > { %848 = vmatprep.subr.bf16.mxu0 %v1468_v4  ;;  %929 = vmatprep.subr.bf16.mxu1 %v1470_v5  ;;  %v1474_v8 = vld [vmem:[%s1897_s10 + $0x44] ss:$16 sps:$4 sm:$0xff]   ;;  %v1476_v9 = vld [vmem:[%s1897_s10 + $0x4c] ss:$16 sps:$4 sm:$0xff]   ;;  %v1478_v10 = vld [vmem:[%s1897_s10 + $0x40] ss:$16 sps:$4 sm:$0xff]  }
  0x6f   : > { %v1479_v11 = vld [vmem:[%s1897_s10 + $0x48] ss:$16 sps:$4 sm:$0xff]   ;;  %v1480_v12 = vld [vmem:[%s1897_s10 + $0x64] ss:$16 sps:$4 sm:$0xff]   ;;  %v1482_v13 = vld [vmem:[%s1897_s10 + $0x6c] ss:$16 sps:$4 sm:$0xff]  }
  0x70   : > { %v1484_v14 = vld [vmem:[%s1897_s10 + $0x60] ss:$16 sps:$4 sm:$0xff]   ;;  %v1485_v15 = vld [vmem:[%s1897_s10 + $0x68] ss:$16 sps:$4 sm:$0xff]   ;;  %v1486_v16 = vld [vmem:[%s1897_s10 + $0x84] ss:$16 sps:$4 sm:$0xff]  }
  0x71   : > { %849 = vmatpush1.bf16.msra.mxu0 %v1472_v6  ;;  %930 = vmatpush1.bf16.msra.mxu1 %v1473_v7  ;;  %v1488_v17 = vld [vmem:[%s1897_s10 + $0x8c] ss:$16 sps:$4 sm:$0xff]   ;;  %v1490_v18 = vld [vmem:[%s1897_s10 + $0x80] ss:$16 sps:$4 sm:$0xff]   ;;  %v1491_v19 = vld [vmem:[%s1897_s10 + $0x88] ss:$16 sps:$4 sm:$0xff]  }
  0x72   : > { %850 = vmatprep.subr.bf16.mxu0 %v1474_v8  ;;  %931 = vmatprep.subr.bf16.mxu1 %v1476_v9  ;;  %v1492_v20 = vld [vmem:[%s1897_s10 + $0xa4] ss:$16 sps:$4 sm:$0xff]   ;;  %v1494_v21 = vld [vmem:[%s1897_s10 + $0xac] ss:$16 sps:$4 sm:$0xff]   ;;  %v1496_v22 = vld [vmem:[%s1897_s10 + $0xa0] ss:$16 sps:$4 sm:$0xff]  }
  0x73   : > { %v1497_v23 = vld [vmem:[%s1897_s10 + $0xa8] ss:$16 sps:$4 sm:$0xff]   ;;  %v1498_v24 = vld [vmem:[%s1897_s10 + $0xc4] ss:$16 sps:$4 sm:$0xff]   ;;  %v1500_v25 = vld [vmem:[%s1897_s10 + $0xcc] ss:$16 sps:$4 sm:$0xff]  }
  0x74   : > { %v1502_v26 = vld [vmem:[%s1897_s10 + $0xc0] ss:$16 sps:$4 sm:$0xff]   ;;  %v1503_v27 = vld [vmem:[%s1897_s10 + $0xc8] ss:$16 sps:$4 sm:$0xff]   ;;  %v1504_v28 = vld [vmem:[%s1897_s10 + $0xe4] ss:$16 sps:$4 sm:$0xff]  }
  0x75   : > { %851 = vmatpush1.bf16.msra.mxu0 %v1478_v10  ;;  %932 = vmatpush1.bf16.msra.mxu1 %v1479_v11  ;;  %v1506_v29 = vld [vmem:[%s1897_s10 + $0xec] ss:$16 sps:$4 sm:$0xff]   ;;  %v1508_v30 = vld [vmem:[%s1897_s10 + $0xe0] ss:$16 sps:$4 sm:$0xff]   ;;  %v1509_v31 = vld [vmem:[%s1897_s10 + $0xe8] ss:$16 sps:$4 sm:$0xff]  }
  0x76   : > { %852 = vmatprep.subr.bf16.mxu0 %v1480_v12  ;;  %933 = vmatprep.subr.bf16.mxu1 %v1482_v13  ;;  %v1510_v32 = vld [vmem:[%s1897_s10 + $0x104] ss:$16 sps:$4 sm:$0xff]   ;;  %v1512_v33 = vld [vmem:[%s1897_s10 + $0x10c] ss:$16 sps:$4 sm:$0xff]   ;;  %v1514_v34 = vld [vmem:[%s1897_s10 + $0x100] ss:$16 sps:$4 sm:$0xff]  }
  0x77   : > { %v1515_v35 = vld [vmem:[%s1897_s10 + $0x108] ss:$16 sps:$4 sm:$0xff]   ;;  %v1516_v36 = vld [vmem:[%s1897_s10 + $0x124] ss:$16 sps:$4 sm:$0xff]   ;;  %v1518_v37 = vld [vmem:[%s1897_s10 + $0x12c] ss:$16 sps:$4 sm:$0xff]  }
  0x78   : > { %v1520_v38 = vld [vmem:[%s1897_s10 + $0x120] ss:$16 sps:$4 sm:$0xff]   ;;  %v1521_v39 = vld [vmem:[%s1897_s10 + $0x128] ss:$16 sps:$4 sm:$0xff]   ;;  %v1522_v40 = vld [vmem:[%s1897_s10 + $0x144] ss:$16 sps:$4 sm:$0xff]  }
  0x79   : > { %853 = vmatpush1.bf16.msra.mxu0 %v1484_v14  ;;  %934 = vmatpush1.bf16.msra.mxu1 %v1485_v15  ;;  %v1524_v41 = vld [vmem:[%s1897_s10 + $0x14c] ss:$16 sps:$4 sm:$0xff]   ;;  %v1526_v42 = vld [vmem:[%s1897_s10 + $0x140] ss:$16 sps:$4 sm:$0xff]   ;;  %v1527_v43 = vld [vmem:[%s1897_s10 + $0x148] ss:$16 sps:$4 sm:$0xff]  }
  0x7a   : > { %854 = vmatprep.subr.bf16.mxu0 %v1486_v16  ;;  %935 = vmatprep.subr.bf16.mxu1 %v1488_v17  ;;  %v1528_v44 = vld [vmem:[%s1897_s10 + $0x164] ss:$16 sps:$4 sm:$0xff]   ;;  %v1530_v45 = vld [vmem:[%s1897_s10 + $0x16c] ss:$16 sps:$4 sm:$0xff]   ;;  %v1532_v49 = vld [vmem:[%s1897_s10 + $0x160] ss:$16 sps:$4 sm:$0xff]  }
  0x7b   : > { %v1952_v46 = vld [vmem:[%s2324_s0 + $0x8] sm:$0xff]  ;;  %v1957_v47 = vld [vmem:[%s2324_s0 + $0x18] sm:$0xff]  ;;  %v1536_v53 = vld [vmem:[%s1897_s10 + $0x18c] ss:$16 sps:$4 sm:$0xff]  }
  0x7c   : > { %v1962_v48 = vld [vmem:[%s2324_s0 + $0x28] sm:$0xff]  ;;  %v269_v51 = vadd.f32 %v1957_v47, %v1952_v46  ;;  %v1973_v54 = vld [vmem:[%s2324_s0 + $0x38] sm:$0xff]  ;;  %v1979_v56 = vld [vmem:[%s2324_s0] sm:$0xff] }
  0x7d   : > { %855 = vmatpush1.bf16.msra.mxu0 %v1490_v18  ;;  %936 = vmatpush1.bf16.msra.mxu1 %v1491_v19  ;;  %v1533_v50 = vld [vmem:[%s1897_s10 + $0x168] ss:$16 sps:$4 sm:$0xff]   ;;  %v1534_v52 = vld [vmem:[%s1897_s10 + $0x184] ss:$16 sps:$4 sm:$0xff]   ;;  %v1984_v57 = vld [vmem:[%s2324_s0 + $0x10] sm:$0xff] }
  0x7e   : > { %856 = vmatprep.subr.bf16.mxu0 %v1492_v20  ;;  %937 = vmatprep.subr.bf16.mxu1 %v1494_v21  ;;  %v270_v55 = vadd.f32 %v269_v51, %v1962_v48  ;;  %v1989_v58 = vld [vmem:[%s2324_s0 + $0x48] sm:$0xff]  ;;  %v1994_v59 = vld [vmem:[%s2324_s0 + $0x20] sm:$0xff]  ;;  %v255_v60 = vadd.f32 %v1984_v57, %v1979_v56  ;;  %v2004_v0 = vld [vmem:[%s2324_s0 + $0x30] sm:$0xff] }
  0x7f   : > { %v1538_v61 = vld [vmem:[%s1897_s10 + $0x180] ss:$16 sps:$4 sm:$0xff]   ;;  %v1539_v62 = vld [vmem:[%s1897_s10 + $0x188] ss:$16 sps:$4 sm:$0xff]   ;;  %v1540_v1 = vld [vmem:[%s1897_s10 + $0x1a4] ss:$16 sps:$4 sm:$0xff]  }
  0x80   : > { %v271_v63 = vadd.f32 %v270_v55, %v1973_v54  ;;  %v1542_v2 = vld [vmem:[%s1897_s10 + $0x1ac] ss:$16 sps:$4 sm:$0xff]   ;;  %v2011_v3 = vld [vmem:[%s2324_s0 + $0x58] sm:$0xff]  ;;  %v256_v4 = vadd.f32 %v255_v60, %v1994_v59  ;;  %v2023_v7 = vld [vmem:[%s2324_s0 + $0x68] sm:$0xff] }
  0x81   : > { %857 = vmatpush1.bf16.msra.mxu0 %v1496_v22  ;;  %938 = vmatpush1.bf16.msra.mxu1 %v1497_v23  ;;  %v2018_v6 = vld [vmem:[%s2324_s0 + $0x40] sm:$0xff]  ;;  %v1545_v10 = vld [vmem:[%s1897_s10 + $0x1a8] ss:$16 sps:$4 sm:$0xff]   ;;  %v2032_v12 = vld [vmem:[%s2324_s0 + $0x50] sm:$0xff] }
  0x82   : > { %858 = vmatprep.subr.bf16.mxu0 %v1498_v24  ;;  %939 = vmatprep.subr.bf16.mxu1 %v1500_v25  ;;  %v272_v5 = vadd.f32 %v271_v63, %v1989_v58  ;;  %v257_v8 = vadd.f32 %v256_v4, %v2004_v0  ;;  %v1544_v9 = vld [vmem:[%s1897_s10 + $0x1a0] ss:$16 sps:$4 sm:$0xff]   ;;  %v1546_v13 = vld [vmem:[%s1897_s10 + $0x1c4] ss:$16 sps:$4 sm:$0xff]   ;;  %v1548_v14 = vld [vmem:[%s1897_s10 + $0x1cc] ss:$16 sps:$4 sm:$0xff]  }
  0x83   : > { %v252_v15 = vld [vmem:[%s2324_s0 + $0x78] sm:$0xff]  ;;  %v2044_v18 = vld [vmem:[%s2324_s0 + $0x60] sm:$0xff]  ;;  %v2049_v19 = vld [vmem:[%s2324_s0 + $0x88] sm:$0xff] }
  0x84   : > { %v273_v11 = vadd.f32 %v272_v5, %v2011_v3  ;;  %v258_v16 = vadd.f32 %v257_v8, %v2018_v6  ;;  %v1550_v21 = vld [vmem:[%s1897_s10 + $0x1c0] ss:$16 sps:$4 sm:$0xff]   ;;  %v1551_v22 = vld [vmem:[%s1897_s10 + $0x1c8] ss:$16 sps:$4 sm:$0xff]   ;;  %v1552_v25 = vld [vmem:[%s1897_s10 + $0x1e4] ss:$16 sps:$4 sm:$0xff]  }
  0x85   : > { %859 = vmatpush1.bf16.msra.mxu0 %v1502_v26  ;;  %940 = vmatpush1.bf16.msra.mxu1 %v1503_v27  ;;  %v2057_v24 = vld [vmem:[%s2324_s0 + $0x70] sm:$0xff] }
  0x86   : > { %860 = vmatprep.subr.bf16.mxu0 %v1504_v28  ;;  %941 = vmatprep.subr.bf16.mxu1 %v1506_v29  ;;  %v274_v17 = vadd.f32 %v273_v11, %v2023_v7  ;;  %v259_v20 = vadd.f32 %v258_v16, %v2032_v12  ;;  %v1554_v26 = vld [vmem:[%s1897_s10 + $0x1ec] ss:$16 sps:$4 sm:$0xff]  }
  0x87   : > { %v2066_v29 = vld [vmem:[%s2324_s0 + $0x80] sm:$0xff] }
  0x88   : > { %v275_v23 = vadd.f32 %v274_v17, %v252_v15  ;;  %v260_v27 = vadd.f32 %v259_v20, %v2044_v18 }
  0x89   : > { %861 = vmatpush1.bf16.msra.mxu0 %v1508_v30  ;;  %942 = vmatpush1.bf16.msra.mxu1 %v1509_v31  ;;  %v1556_v31 = vld [vmem:[%s1897_s10 + $0x1e0] ss:$16 sps:$4 sm:$0xff]  }
  0x8a   : > { %862 = vmatprep.subr.bf16.mxu0 %v1510_v32  ;;  %943 = vmatprep.subr.bf16.mxu1 %v1512_v33  ;;  %v276_v28 = vadd.f32 %v275_v23, %v2049_v19  ;;  %v261_v30 = vadd.f32 %v260_v27, %v2057_v24  ;;  %v1557_v32 = vld [vmem:[%s1897_s10 + $0x1e8] ss:$16 sps:$4 sm:$0xff]   ;;  %s1398_s10 = smul.u32 144, %s209_s9  ;;  %s1397_s9 = sshll.u32 (%p2346_p7), %s1742_s19, 4 }
  0x8b   : > { %s2276_s12 = scalar_lea.vmem (%p2346_p7), %s2328_s4, %s1397_s9 }
  0x8c   : > { %v277_v33 = vrot.slane %v276_v28, 4  ;;  %s2247_s25 = scalar_lea.vmem [#allocation7], %s1398_s10 }
  0x8d   : > { %863 = vmatpush1.bf16.msra.mxu0 %v1514_v34  ;;  %944 = vmatpush1.bf16.msra.mxu1 %v1515_v35  ;;  %v262_v34 = vadd.f32 %v261_v30, %v2066_v29 }
  0x8e   : > { %864 = vmatprep.subr.bf16.mxu0 %v1516_v36  ;;  %945 = vmatprep.subr.bf16.mxu1 %v1518_v37  ;;  %v278_v35 = vadd.f32 %v277_v33, %v276_v28 }
  0x8f   : > { %v263_v36 = vrot.slane %v262_v34, 4 }
  0x90   : > { %v279_v37 = vrot.slane %v278_v35, 2 }
  0x91   : > { %865 = vmatpush1.bf16.msra.mxu0 %v1520_v38  ;;  %946 = vmatpush1.bf16.msra.mxu1 %v1521_v39  ;;  %v264_v38 = vadd.f32 %v263_v36, %v262_v34 }
  0x92   : > { %866 = vmatprep.subr.bf16.mxu0 %v1522_v40  ;;  %947 = vmatprep.subr.bf16.mxu1 %v1524_v41  ;;  %v280_v39 = vadd.f32 %v279_v37, %v278_v35 }
  0x93   : > { %v265_v40 = vrot.slane %v264_v38, 2 }
  0x94   : > { %v281_v41 = vrot.slane %v280_v39, 1 }
  0x95   : > { %867 = vmatpush1.bf16.msra.mxu0 %v1526_v42  ;;  %948 = vmatpush1.bf16.msra.mxu1 %v1527_v43  ;;  %v266_v42 = vadd.f32 %v265_v40, %v264_v38 }
  0x96   : > { %868 = vmatprep.subr.bf16.mxu0 %v1528_v44  ;;  %949 = vmatprep.subr.bf16.mxu1 %v1530_v45  ;;  %v282_v43 = vadd.f32 %v281_v41, %v280_v39 }
  0x97   : > { %v267_v44 = vrot.slane %v266_v42, 1 }
  0x98   : > { %v285_v45 = vmul.f32 0.013888889, %v282_v43 }
  0x99   : > { %869 = vmatpush1.bf16.msra.mxu0 %v1532_v49  ;;  %950 = vmatpush1.bf16.msra.mxu1 %v1533_v50  ;;  %v268_v49 = vadd.f32 %v267_v44, %v266_v42 }
  0x9a   : > { %870 = vmatprep.subr.bf16.mxu0 %v1534_v52  ;;  %951 = vmatprep.subr.bf16.mxu1 %v1536_v53  ;;  %v2073_v50 = vsub.f32 %v1952_v46, %v285_v45  ;;  %v2076_v51 = vsub.f32 %v1957_v47, %v285_v45  ;;  %v2079_v52 = vsub.f32 %v1962_v48, %v285_v45 }
  0x9b   : > { %v2082_v53 = vsub.f32 %v1973_v54, %v285_v45  ;;  %v2085_v55 = vsub.f32 %v1989_v58, %v285_v45  ;;  %v2094_v47 = vsub.f32 %v2011_v3, %v285_v45  ;;  %v2099_v58 = vsub.f32 %v2023_v7, %v285_v45 }
  0x9c   : > { %v305_v60 = vmul.f32 %v2073_v50, %v2073_v50  ;;  %v309_v46 = vmul.f32 %v2079_v52, %v2079_v52  ;;  %v2115_v8 = vsub.f32 %v252_v15, %v285_v45 }
  0x9d   : > { %871 = vmatpush1.bf16.msra.mxu0 %v1538_v61  ;;  %952 = vmatpush1.bf16.msra.mxu1 %v1539_v62  ;;  %v307_v61 = vmul.f32 %v2076_v51, %v2076_v51  ;;  %v311_v48 = vmul.f32 %v2082_v53, %v2082_v53  ;;  %v284_v62 = vmul.f32 0.013888889, %v268_v49  ;;  %v313_v63 = vmul.f32 %v2085_v55, %v2085_v55 }
  0x9e   : > { %872 = vmatprep.subr.bf16.mxu0 %v1540_v1  ;;  %953 = vmatprep.subr.bf16.mxu1 %v1542_v2  ;;  %v315_v7 = vmul.f32 %v2094_v47, %v2094_v47  ;;  %v317_v11 = vmul.f32 %v2099_v58, %v2099_v58  ;;  %v319_v16 = vmul.f32 %v2115_v8, %v2115_v8  ;;  %v376_v49 = vlaneseq }
  0x9f   : > { %v336_v54 = vadd.f32 %v307_v61, %v305_v60  ;;  %v2104_v2 = vsub.f32 %v1979_v56, %v284_v62  ;;  %v2107_v4 = vsub.f32 %v1984_v57, %v284_v62  ;;  %v2110_v3 = vsub.f32 %v1994_v59, %v284_v62 }
  0xa0   : > { %v2113_v5 = vsub.f32 %v2004_v0, %v284_v62  ;;  %v2122_v56 = vsub.f32 %v2018_v6, %v284_v62  ;;  %v2129_v0 = vsub.f32 %v2049_v19, %v285_v45  ;;  %v2141_v20 = vsub.f32 %v2044_v18, %v284_v62 }
  0xa1   : > { %873 = vmatpush1.bf16.msra.mxu0 %v1544_v9  ;;  %954 = vmatpush1.bf16.msra.mxu1 %v1545_v10  ;;  %v337_v1 = vadd.f32 %v336_v54, %v309_v46  ;;  %v304_v10 = vmul.f32 %v2104_v2, %v2104_v2  ;;  %v306_v57 = vmul.f32 %v2107_v4, %v2107_v4 }
  0xa2   : > { %874 = vmatprep.subr.bf16.mxu0 %v1546_v13  ;;  %955 = vmatprep.subr.bf16.mxu1 %v1548_v14  ;;  %v308_v59 = vmul.f32 %v2110_v3, %v2110_v3  ;;  %v2134_v14 = vsub.f32 %v2032_v12, %v284_v62  ;;  %v310_v6 = vmul.f32 %v2113_v5, %v2113_v5 }
  0xa3   : > { %v338_v9 = vadd.f32 %v337_v1, %v311_v48  ;;  %v322_v15 = vadd.f32 %v306_v57, %v304_v10  ;;  %v312_v19 = vmul.f32 %v2122_v56, %v2122_v56  ;;  %v2148_v23 = vsub.f32 %v2057_v24, %v284_v62 }
  0xa4   : > { %v2153_v28 = vsub.f32 %v2066_v29, %v284_v62  ;;  %v316_v18 = vmul.f32 %v2141_v20, %v2141_v20  ;;  %v377_v48 = vshrl.u32 %v376_v49, 7 }
  0xa5   : > { %875 = vmatpush1.bf16.msra.mxu0 %v1550_v21  ;;  %956 = vmatpush1.bf16.msra.mxu1 %v1551_v22  ;;  %v339_v13 = vadd.f32 %v338_v9, %v313_v63  ;;  %v323_v21 = vadd.f32 %v322_v15, %v308_v59  ;;  %v321_v22 = vmul.f32 %v2129_v0, %v2129_v0  ;;  %v404_v9 = vld [vmem:[#allocation4] sm:$0x3] }
  0xa6   : > { %876 = vmatprep.subr.bf16.mxu0 %v1552_v25  ;;  %957 = vmatprep.subr.bf16.mxu1 %v1554_v26  ;;  %v314_v25 = vmul.f32 %v2134_v14, %v2134_v14  ;;  %v320_v24 = vmul.f32 %v2153_v28, %v2153_v28  ;;  %v382_v63 = vsub.s32 1, %v377_v48 }
  0xa7   : > { %v340_v17 = vadd.f32 %v339_v13, %v315_v7  ;;  %v324_v26 = vadd.f32 %v323_v21, %v310_v6  ;;  %v374_v7 = vld [vmem:[#allocation2] sm:$0x3] }
  0xa8   : > { %v2161_v10 = vrot.slane %v374_v7, %v382_v63  ;;  %v2165_v59 = vrot.slane %v404_v9, %v382_v63 }
  0xa9   : > { %877 = vmatpush1.bf16.msra.mxu0 %v1556_v31  ;;  %958 = vmatpush1.bf16.msra.mxu1 %v1557_v32  ;;  %v341_v12 = vadd.f32 %v340_v17, %v317_v11  ;;  %v325_v30 = vadd.f32 %v324_v26, %v312_v19  ;;  %v318_v32 = vmul.f32 %v2148_v23, %v2148_v23 }
  0xab   : > { %v342_v27 = vadd.f32 %v341_v12, %v319_v16  ;;  %v326_v33 = vadd.f32 %v325_v30, %v314_v25  ;;  %v378_v16 = vsub.s32 0, %v377_v48 }
  0xad   : > { %v343_v31 = vadd.f32 %v342_v27, %v321_v22  ;;  %v327_v35 = vadd.f32 %v326_v33, %v316_v18  ;;  %v2183_v25 = vrot.slane %v404_v9, %v378_v16 }
  0xaf   : > { %v344_v34 = vrot.slane %v343_v31, 4  ;;  %v328_v37 = vadd.f32 %v327_v35, %v318_v32 }
  0xb1   : > { %v345_v36 = vadd.f32 %v344_v34, %v343_v31  ;;  %v329_v39 = vadd.f32 %v328_v37, %v320_v24 }
  0xb3   : > { %v346_v38 = vrot.slane %v345_v36, 2  ;;  %v330_v40 = vrot.slane %v329_v39, 4 }
  0xb5   : > { %v347_v29 = vadd.f32 %v346_v38, %v345_v36  ;;  %v331_v42 = vadd.f32 %v330_v40, %v329_v39 }
  0xb7   : > { %v348_v41 = vrot.slane %v347_v29, 1  ;;  %v332_v44 = vrot.slane %v331_v42, 2 }
  0xb9   : > { %v349_v43 = vadd.f32 %v348_v41, %v347_v29  ;;  %v333_v60 = vadd.f32 %v332_v44, %v331_v42 }
  0xbb   : > { %v351_v45 = vmul.f32 0.013888889, %v349_v43  ;;  %v334_v46 = vrot.slane %v333_v60, 1 }
  0xbd   : > { %v353_v61 = vadd.f32 1e-05, %v351_v45  ;;  %v335_v54 = vadd.f32 %v334_v46, %v333_v60 }
  0xbf   : > { %1558 = vrsqrt.f32 %v353_v61  ;;  %v350_v62 = vmul.f32 0.013888889, %v335_v54 }
  0xc1   : > { %v352_v1 = vadd.f32 1e-05, %v350_v62 }
  0xc3   : > { %1560 = vrsqrt.f32 %v352_v1 }
  0xc9   : > { %v2163_v57 = vpop.eup %1558 }
  0xca   : > { %v357_v11 = vmul.f32 %v2163_v57, %v2073_v50  ;;  %v359_v13 = vmul.f32 %v2163_v57, %v2076_v51  ;;  %v361_v6 = vmul.f32 %v2163_v57, %v2079_v52  ;;  %v363_v15 = vmul.f32 %v2163_v57, %v2082_v53 }
  0xcb   : > { %v2181_v51 = vrot.slane %v374_v7, %v378_v16  ;;  %v365_v52 = vmul.f32 %v2163_v57, %v2085_v55  ;;  %v367_v53 = vmul.f32 %v2163_v57, %v2094_v47  ;;  %v369_v41 = vmul.f32 %v2163_v57, %v2099_v58 }
  0xcc   : > { %v387_v17 = vmul.f32 %v2161_v10, %v357_v11  ;;  %v389_v19 = vmul.f32 %v2161_v10, %v359_v13  ;;  %v391_v21 = vmul.f32 %v2161_v10, %v361_v6  ;;  %v393_v22 = vmul.f32 %v2161_v10, %v363_v15 }
  0xcd   : > { %v2189_v26 = vpop.eup %1560  ;;  %v399_v1 = vmul.f32 %v2161_v10, %v369_v41 }
  0xce   : > { %v417_v50 = vadd.f32 %v2165_v59, %v387_v17  ;;  %v419_v12 = vadd.f32 %v2165_v59, %v389_v19  ;;  %v421_v30 = vadd.f32 %v2165_v59, %v391_v21  ;;  %v423_v31 = vadd.f32 %v2165_v59, %v393_v22 }
  0xcf   : > { %v356_v32 = vmul.f32 %v2189_v26, %v2104_v2  ;;  %v358_v33 = vmul.f32 %v2189_v26, %v2107_v4  ;;  %v360_v55 = vmul.f32 %v2189_v26, %v2110_v3  ;;  %v362_v47 = vmul.f32 %v2189_v26, %v2113_v5 }
  0xd0   : > { %v435_v27 = vmax.f32 %v417_v50, 0.0  ;;  %v437_v18 = vmax.f32 %v419_v12, 0.0  ;;  %v439_v2 = vmax.f32 %v421_v30, 0.0  ;;  %v441_v38 = vmax.f32 %v423_v31, 0.0 }
  0xd1   : > { %v386_v24 = vmul.f32 %v2181_v51, %v356_v32  ;;  %v388_v35 = vmul.f32 %v2181_v51, %v358_v33  ;;  %v390_v36 = vmul.f32 %v2181_v51, %v360_v55  ;;  %v392_v37 = vmul.f32 %v2181_v51, %v362_v47 }
  0xd2   : > { %v453_v34 = vpack.c.bf16 %v437_v18, %v435_v27  ;;  %v395_v4 = vmul.f32 %v2161_v10, %v365_v52  ;;  %v397_v3 = vmul.f32 %v2161_v10, %v367_v53  ;;  %v364_v29 = vmul.f32 %v2189_v26, %v2122_v56 }
  0xd3   : > { %v416_v39 = vadd.f32 %v2183_v25, %v386_v24  ;;  %v418_v5 = vadd.f32 %v2183_v25, %v388_v35  ;;  %v366_v40 = vmul.f32 %v2189_v26, %v2134_v14  ;;  %v420_v44 = vadd.f32 %v2183_v25, %v390_v36 }
  0xd4   : > { %878 = vmatprep.mubr.bf16.mxu0 %v453_v34  ;;  %959 = vmatprep.mubr.bf16.mxu1 %v453_v34  ;;  %v422_v45 = vadd.f32 %v2183_v25, %v392_v37  ;;  %v455_v49 = vpack.c.bf16 %v441_v38, %v439_v2  ;;  %v425_v60 = vadd.f32 %v2165_v59, %v395_v4 }
  0xd5   : > { %v434_v42 = vmax.f32 %v416_v39, 0.0  ;;  %v436_v43 = vmax.f32 %v418_v5, 0.0  ;;  %v427_v61 = vadd.f32 %v2165_v59, %v397_v3  ;;  %v371_v56 = vmul.f32 %v2163_v57, %v2115_v8 }
  0xd6   : > { %v438_v14 = vmax.f32 %v420_v44, 0.0  ;;  %v440_v48 = vmax.f32 %v422_v45, 0.0  ;;  %v394_v58 = vmul.f32 %v2181_v51, %v364_v29  ;;  %v396_v54 = vmul.f32 %v2181_v51, %v366_v40 }
  0xd7   : > { %v452_v46 = vpack.c.bf16 %v436_v43, %v434_v42  ;;  %v443_v62 = vmax.f32 %v425_v60, 0.0  ;;  %v445_v63 = vmax.f32 %v427_v61, 0.0  ;;  %v401_v7 = vmul.f32 %v2161_v10, %v371_v56 }
  0xd8   : > { %v368_v8 = vmul.f32 %v2189_v26, %v2141_v20  ;;  %v454_v9 = vpack.c.bf16 %v440_v48, %v438_v14  ;;  %v424_v11 = vadd.f32 %v2183_v25, %v394_v58  ;;  %v426_v13 = vadd.f32 %v2183_v25, %v396_v54 }
  0xd9   : > { %879 = vmatmul.mubr.bf16.vlgmr.msra.gmra.mrb[0].mxu0 %v452_v46  ;;  %960 = vmatmul.mubr.bf16.vlgmr.msra.gmra.mrb[0].mxu1 %v452_v46  ;;  %v370_v6 = vmul.f32 %v2189_v26, %v2148_v23  ;;  %v457_v15 = vpack.c.bf16 %v445_v63, %v443_v62  ;;  %v429_v16 = vadd.f32 %v2165_v59, %v399_v1 }
  0xda   : > { %888 = vmatprep.mubr.bf16.mxu0 %v455_v49  ;;  %969 = vmatprep.mubr.bf16.mxu1 %v455_v49  ;;  %v431_v17 = vadd.f32 %v2165_v59, %v401_v7  ;;  %v373_v19 = vmul.f32 %v2163_v57, %v2129_v0  ;;  %v442_v21 = vmax.f32 %v424_v11, 0.0  ;;  %v444_v20 = vmax.f32 %v426_v13, 0.0 }
  0xdb   : > { %v398_v22 = vmul.f32 %v2181_v51, %v368_v8  ;;  %v400_v50 = vmul.f32 %v2181_v51, %v370_v6  ;;  %v447_v12 = vmax.f32 %v429_v16, 0.0  ;;  %v372_v0 = vmul.f32 %v2189_v26, %v2153_v28 }
  0xdc   : > { %v449_v23 = vmax.f32 %v431_v17, 0.0  ;;  %v403_v52 = vmul.f32 %v2161_v10, %v373_v19  ;;  %v456_v53 = vpack.c.bf16 %v444_v20, %v442_v21 }
  0xdd   : > { %v428_v27 = vadd.f32 %v2183_v25, %v398_v22  ;;  %v430_v18 = vadd.f32 %v2183_v25, %v400_v50  ;;  %v402_v33 = vmul.f32 %v2181_v51, %v372_v0 }
  0xde   : > { %v459_v57 = vpack.c.bf16 %v449_v23, %v447_v12  ;;  %v433_v30 = vadd.f32 %v2165_v59, %v403_v52 }
  0xdf   : > { %v446_v31 = vmax.f32 %v428_v27, 0.0  ;;  %v448_v32 = vmax.f32 %v430_v18, 0.0  ;;  %v432_v47 = vadd.f32 %v2183_v25, %v402_v33 }
  0xe0   : > { %v451_v10 = vmax.f32 %v433_v30, 0.0 }
  0xe1   : > { %889 = vmatmul.mubr.bf16.gmra.mrb[4].mxu0 %v454_v9  ;;  %970 = vmatmul.mubr.bf16.gmra.mrb[4].mxu1 %v454_v9  ;;  %v458_v55 = vpack.c.bf16 %v448_v32, %v446_v31  ;;  %v450_v28 = vmax.f32 %v432_v47, 0.0 }
  0xe2   : > { %898 = vmatprep.mubr.bf16.mxu0 %v457_v15  ;;  %979 = vmatprep.mubr.bf16.mxu1 %v457_v15  ;;  %v461_v34 = vpack.c.bf16 %v451_v10, %v451_v10 }
  0xe3   : > { %v460_v59 = vpack.c.bf16 %v450_v28, %v450_v28 }
  0xe9   : > { %899 = vmatmul.mubr.bf16.gmra.mrb[8].mxu0 %v456_v53  ;;  %980 = vmatmul.mubr.bf16.gmra.mrb[8].mxu1 %v456_v53 }
  0xea   : > { %908 = vmatprep.mubr.bf16.mxu0 %v459_v57  ;;  %989 = vmatprep.mubr.bf16.mxu1 %v459_v57 }
  0xf1   : > { %909 = vmatmul.mubr.bf16.gmra.mrb[12].mxu0 %v458_v55  ;;  %990 = vmatmul.mubr.bf16.gmra.mrb[12].mxu1 %v458_v55 }
  0xf2   : > { %918 = vmatprep.mubr.bf16.mxu0 %v461_v34  ;;  %999 = vmatprep.mubr.bf16.mxu1 %v461_v34 }
  0xf9   : > { %919 = vmatmul.mubr.bf16.gmra.mrb[16].mxu0 %v460_v59  ;;  %1000 = vmatmul.mubr.bf16.gmra.mrb[16].mxu1 %v460_v59 }
 0x1ac   : > { %v880_v26 = vpop.f32.mrb[0].mxu0  ;;  %v961_v24 = vpop.f32.mrb[0].mxu1 }
 0x1ad   : > { %v882_v51 = vpop.f32.mrb[1].mxu0  ;;  %v963_v35 = vpop.f32.mrb[1].mxu1 }
 0x1ae   : > { %v1379_v36 = vpack.c.bf16 %v882_v51, %v880_v26  ;;  %v1380_v37 = vpack.c.bf16 %v963_v35, %v961_v24  ;;  %v884_v2 = vpop.f32.mrb[2].mxu0  ;;  %v965_v38 = vpop.f32.mrb[2].mxu1 }
 0x1af   : > { %v886_v25 = vpop.f32.mrb[3].mxu0  ;;  %v967_v4 = vpop.f32.mrb[3].mxu1 }
 0x1b0   : > { %1120 = vst [vmem:[%s2247_s25] sm:$0xff] %v1379_v36  ;;  %1121 = vst [vmem:[%s2247_s25 + $0x8] sm:$0xff] %v1380_v37  ;;  %v1381_v3 = vpack.c.bf16 %v886_v25, %v884_v2  ;;  %v1382_v39 = vpack.c.bf16 %v967_v4, %v965_v38 }
 0x1b2   : > { %1122 = vst [vmem:[%s2247_s25 + $0x10] sm:$0xff] %v1381_v3  ;;  %1123 = vst [vmem:[%s2247_s25 + $0x18] sm:$0xff] %v1382_v39 }
 0x1b4   : > { %v890_v5 = vpop.f32.mrb[4].mxu0  ;;  %v971_v29 = vpop.f32.mrb[4].mxu1 }
 0x1b5   : > { %v892_v40 = vpop.f32.mrb[5].mxu0  ;;  %v973_v41 = vpop.f32.mrb[5].mxu1 }
 0x1b6   : > { %v1383_v42 = vpack.c.bf16 %v892_v40, %v890_v5  ;;  %v1384_v43 = vpack.c.bf16 %v973_v41, %v971_v29  ;;  %v894_v44 = vpop.f32.mrb[6].mxu0  ;;  %v975_v45 = vpop.f32.mrb[6].mxu1 }
 0x1b7   : > { %v896_v49 = vpop.f32.mrb[7].mxu0  ;;  %v977_v60 = vpop.f32.mrb[7].mxu1  ;;  %v1160_v10 = vld [vmem:[%s2247_s25] sm:$0xff] (%p2346_p7)  ;;  %v1162_v55 = vld [vmem:[%s2247_s25 + $0x8] sm:$0xff] (%p2346_p7) }
 0x1b8   : > { %1124 = vst [vmem:[%s2247_s25 + $0x20] sm:$0xff] %v1383_v42  ;;  %1125 = vst [vmem:[%s2247_s25 + $0x28] sm:$0xff] %v1384_v43  ;;  %v1385_v61 = vpack.c.bf16 %v896_v49, %v894_v44  ;;  %v1386_v56 = vpack.c.bf16 %v977_v60, %v975_v45 }
 0x1b9   : > { %v1164_v47 = vld [vmem:[%s2247_s25 + $0x10] sm:$0xff] (%p2346_p7)  ;;  %v1166_v34 = vld [vmem:[%s2247_s25 + $0x18] sm:$0xff] (%p2346_p7)  ;;  %1161 = vst [vmem:[%s2276_s12] sm:$0xff] (%p2346_p7), %v1160_v10  ;;  %1163 = vst [vmem:[%s2276_s12 + $0x8] sm:$0xff] (%p2346_p7), %v1162_v55 }
 0x1ba   : > { %1126 = vst [vmem:[%s2247_s25 + $0x30] sm:$0xff] %v1385_v61  ;;  %1127 = vst [vmem:[%s2247_s25 + $0x38] sm:$0xff] %v1386_v56 }
 0x1bb   : > { %1165 = vst [vmem:[%s2276_s12 + $0x90] sm:$0xff] (%p2346_p7), %v1164_v47  ;;  %1167 = vst [vmem:[%s2276_s12 + $0x98] sm:$0xff] (%p2346_p7), %v1166_v34 }
 0x1bc   : > { %v900_v46 = vpop.f32.mrb[8].mxu0  ;;  %v981_v14 = vpop.f32.mrb[8].mxu1 }
 0x1bd   : > { %v902_v48 = vpop.f32.mrb[9].mxu0  ;;  %v983_v58 = vpop.f32.mrb[9].mxu1 }
 0x1be   : > { %v1387_v54 = vpack.c.bf16 %v902_v48, %v900_v46  ;;  %v1388_v62 = vpack.c.bf16 %v983_v58, %v981_v14  ;;  %v904_v63 = vpop.f32.mrb[10].mxu0  ;;  %v985_v1 = vpop.f32.mrb[10].mxu1 }
 0x1bf   : > { %v906_v7 = vpop.f32.mrb[11].mxu0  ;;  %v987_v8 = vpop.f32.mrb[11].mxu1  ;;  %v1168_v28 = vld [vmem:[%s2247_s25 + $0x20] sm:$0xff] (%p2346_p7)  ;;  %v1170_v59 = vld [vmem:[%s2247_s25 + $0x28] sm:$0xff] (%p2346_p7) }
 0x1c0   : > { %1128 = vst [vmem:[%s2247_s25 + $0x40] sm:$0xff] %v1387_v54  ;;  %1129 = vst [vmem:[%s2247_s25 + $0x48] sm:$0xff] %v1388_v62  ;;  %v1389_v9 = vpack.c.bf16 %v906_v7, %v904_v63  ;;  %v1390_v11 = vpack.c.bf16 %v987_v8, %v985_v1 }
 0x1c1   : > { %1169 = vst [vmem:[%s2276_s12 + $0x120] sm:$0xff] (%p2346_p7), %v1168_v28  ;;  %1171 = vst [vmem:[%s2276_s12 + $0x128] sm:$0xff] (%p2346_p7), %v1170_v59  ;;  %v1172_v26 = vld [vmem:[%s2247_s25 + $0x30] sm:$0xff] (%p2346_p7)  ;;  %v1174_v24 = vld [vmem:[%s2247_s25 + $0x38] sm:$0xff] (%p2346_p7) }
 0x1c2   : > { %1130 = vst [vmem:[%s2247_s25 + $0x50] sm:$0xff] %v1389_v9  ;;  %1131 = vst [vmem:[%s2247_s25 + $0x58] sm:$0xff] %v1390_v11 }
 0x1c3   : > { %1173 = vst [vmem:[%s2276_s12 + $0x1b0] sm:$0xff] (%p2346_p7), %v1172_v26  ;;  %1175 = vst [vmem:[%s2276_s12 + $0x1b8] sm:$0xff] (%p2346_p7), %v1174_v24 }
 0x1c4   : > { %v910_v13 = vpop.f32.mrb[12].mxu0  ;;  %v991_v6 = vpop.f32.mrb[12].mxu1 }
 0x1c5   : > { %v912_v15 = vpop.f32.mrb[13].mxu0  ;;  %v993_v16 = vpop.f32.mrb[13].mxu1 }
 0x1c6   : > { %v1391_v17 = vpack.c.bf16 %v912_v15, %v910_v13  ;;  %v1392_v19 = vpack.c.bf16 %v993_v16, %v991_v6  ;;  %v914_v21 = vpop.f32.mrb[14].mxu0  ;;  %v995_v20 = vpop.f32.mrb[14].mxu1 }
 0x1c7   : > { %v916_v22 = vpop.f32.mrb[15].mxu0  ;;  %v997_v50 = vpop.f32.mrb[15].mxu1  ;;  %v1176_v51 = vld [vmem:[%s2247_s25 + $0x40] sm:$0xff] (%p2346_p7)  ;;  %v1178_v35 = vld [vmem:[%s2247_s25 + $0x48] sm:$0xff] (%p2346_p7) }
 0x1c8   : > { %1132 = vst [vmem:[%s2247_s25 + $0x60] sm:$0xff] %v1391_v17  ;;  %1133 = vst [vmem:[%s2247_s25 + $0x68] sm:$0xff] %v1392_v19  ;;  %v1393_v12 = vpack.c.bf16 %v916_v22, %v914_v21  ;;  %v1394_v23 = vpack.c.bf16 %v997_v50, %v995_v20 }
 0x1c9   : > { %1177 = vst [vmem:[%s2276_s12 + $0x240] sm:$0xff] (%p2346_p7), %v1176_v51  ;;  %v1180_v36 = vld [vmem:[%s2247_s25 + $0x50] sm:$0xff] (%p2346_p7)  ;;  %v1182_v37 = vld [vmem:[%s2247_s25 + $0x58] sm:$0xff] (%p2346_p7)  ;;  %1179 = vst [vmem:[%s2276_s12 + $0x248] sm:$0xff] (%p2346_p7), %v1178_v35 }
 0x1ca   : > { %1134 = vst [vmem:[%s2247_s25 + $0x70] sm:$0xff] %v1393_v12  ;;  %1135 = vst [vmem:[%s2247_s25 + $0x78] sm:$0xff] %v1394_v23  ;;  %1144 = sbr.rel (!%p2346_p7) target bundleno = 473 (0x1d9), region = 52 }
 0x1cb   : > { %1181 = vst [vmem:[%s2276_s12 + $0x2d0] sm:$0xff] (%p2346_p7), %v1180_v36  ;;  %1183 = vst [vmem:[%s2276_s12 + $0x2d8] sm:$0xff] (%p2346_p7), %v1182_v37 }
 0x1cc   : > { %v920_v52 = vpop.f32.mrb[16].mxu0  ;;  %v1001_v53 = vpop.f32.mrb[16].mxu1 }
 0x1cd   : > { %v922_v27 = vpop.f32.mrb[17].mxu0  ;;  %v1003_v18 = vpop.f32.mrb[17].mxu1 }
 0x1ce   : > { %v1395_v0 = vpack.c.bf16 %v922_v27, %v920_v52  ;;  %v1396_v57 = vpack.c.bf16 %v1003_v18, %v1001_v53  ;;  %v924_v30 = vpop.f32.mrb[18].mxu0  ;;  %v1005_v31 = vpop.f32.mrb[18].mxu1 }
 0x1cf   : > { %v925_v32 = vpop.f32.mrb[19].mxu0  ;;  %v1006_v33 = vpop.f32.mrb[19].mxu1  ;;  %v1184_v2 = vld [vmem:[%s2247_s25 + $0x60] sm:$0xff] (%p2346_p7)  ;;  %v1186_v38 = vld [vmem:[%s2247_s25 + $0x68] sm:$0xff] (%p2346_p7) }
 0x1d0   : > { %1136 = vst [vmem:[%s2247_s25 + $0x80] sm:$0xff] %v1395_v0  ;;  %1137 = vst [vmem:[%s2247_s25 + $0x88] sm:$0xff] %v1396_v57 }
 0x1d1   : > { %v1188_v25 = vld [vmem:[%s2247_s25 + $0x70] sm:$0xff]  ;;  %1185 = vst [vmem:[%s2276_s12 + $0x360] sm:$0xff] %v1184_v2  ;;  %1187 = vst [vmem:[%s2276_s12 + $0x368] sm:$0xff] %v1186_v38  ;;  %v1190_v4 = vld [vmem:[%s2247_s25 + $0x78] sm:$0xff] }
 0x1d2   : > { %1189 = vst [vmem:[%s2276_s12 + $0x3f0] sm:$0xff] %v1188_v25  ;;  %1191 = vst [vmem:[%s2276_s12 + $0x3f8] sm:$0xff] %v1190_v4 }
 0x1d7   : > { %v1192_v3 = vld [vmem:[%s2247_s25 + $0x80] sm:$0xff]  ;;  %v1194_v39 = vld [vmem:[%s2247_s25 + $0x88] sm:$0xff] }
 0x1d8   : > { %1193 = vst [vmem:[%s2276_s12 + $0x480] sm:$0xff] %v1192_v3  ;;  %1195 = vst [vmem:[%s2276_s12 + $0x488] sm:$0xff] %v1194_v39 }
 0x1d9 PF: > { %p13_p9 = scmp.ge.s32.totalorder %s1745_s20, 11   ;;  %s2347_s15 = smov %s1682_s16 }
 0x1da   : > { %s2348_s16 = smov %s1686_s17  ;;  %s2349_s17 = smov %s1755_s23 }
 0x1db   : > { %s2350_s18 = smov %s1745_s20  ;;  %15 = sbr.rel (!%p13_p9) target bundleno = 3 (0x3), region = 106 }
 0x1e2   :  { %1211 = vsyncpa [#allocation3], 1 }
 0x1e3   :  { %1213 = vsyncpa [#allocation3 + $0x1], 1 }
 0x1e4   :  { %1214 = vsyncpa [#allocation5], 1 }

// kernel: generator_forward.3
= control target key start
LH: loop header
LB: loop body
LE: loop exit
PB: predicated region body
PF: predicated region fallthrough
CT: control target
= control target key end

     0   :  { %v2075_v0 = vmov 0.0   ;;  %vm1050_vm0 = vmmov 0   ;;  %s2070_s3 = inlined_call_operand.vmem [shape: bf16[128,128], index: 3, kind: input, shape index: {}]   ;;  %s2071_s0 = inlined_call_operand.vmem [shape: f32[392,128], index: 0, kind: input, shape index: {}]   ;;  %s2072_s1 = inlined_call_operand.vmem [shape: f32[1,128], index: 1, kind: input, shape index: {}]   ;;  %s2073_s2 = inlined_call_operand.vmem [shape: f32[1,128], index: 2, kind: input, shape index: {}]   ;;  %s2074_s4 = inlined_call_operand.vmem [shape: f32[392,128], index: 4, kind: output, shape index: {}]  }
   0x1   :  { %905 = vmatprep.subr.bf16.mxu0 %v2075_v0  ;;  %v1039_v1 = vld [vmem:[%s2070_s3] sm:$0xff]   ;;  %1021 = vmatprep.subr.bf16.mxu1 %v2075_v0  ;;  %v1040_v2 = vld [vmem:[%s2070_s3 + $0x8] sm:$0xff]   ;;  %v1041_v3 = vld [vmem:[%s2070_s3 + $0x10] sm:$0xff]  }
   0x2   :  { %921 = vmatprep.mubr.msk.bf16.mxu0 %vm1050_vm0, %v2075_v0  ;;  %973 = vmatprep.mubr.msk.bf16.mxu1 %vm1050_vm0, %v2075_v0  ;;  %v1098_v4 = vld [vmem:[%s2071_s0] sm:$0xff]  ;;  %v1103_v5 = vld [vmem:[%s2071_s0 + $0x8] sm:$0xff]  ;;  %v1108_v6 = vld [vmem:[%s2071_s0 + $0x10] sm:$0xff] }
   0x3   :  { %906 = vmatpush3.bf16.msra.mxu0 %v1039_v1  ;;  %1029 = vmatpush3.bf16.msra.mxu1 %v1039_v1  ;;  %v67_v7 = vadd.f32 %v1103_v5, %v1098_v4  ;;  %v1042_v8 = vld [vmem:[%s2070_s3 + $0x18] sm:$0xff]   ;;  %v1126_v11 = vld [vmem:[%s2071_s0 + $0x20] sm:$0xff]  ;;  %v1135_v14 = vld [vmem:[%s2071_s0 + $0x28] sm:$0xff] }
   0x4   :  { %907 = vmatprep.subr.bf16.mxu0 %v2075_v0  ;;  %1022 = vmatprep.subr.bf16.mxu1 %v2075_v0  ;;  %v1118_v9 = vld [vmem:[%s2071_s0 + $0x18] sm:$0xff]  ;;  %v1043_v13 = vld [vmem:[%s2070_s3 + $0x20] sm:$0xff]   ;;  %v1143_v16 = vld [vmem:[%s2071_s0 + $0x30] sm:$0xff] }
   0x5   :  { %v68_v10 = vadd.f32 %v67_v7, %v1108_v6  ;;  %v1044_v18 = vld [vmem:[%s2070_s3 + $0x28] sm:$0xff]   ;;  %v1152_v19 = vld [vmem:[%s2071_s0 + $0x38] sm:$0xff]  ;;  %v1160_v21 = vld [vmem:[%s2071_s0 + $0x40] sm:$0xff] }
   0x6   :  { %v1045_v23 = vld [vmem:[%s2070_s3 + $0x30] sm:$0xff]   ;;  %v1169_v24 = vld [vmem:[%s2071_s0 + $0x48] sm:$0xff]  ;;  %v1046_v28 = vld [vmem:[%s2070_s3 + $0x38] sm:$0xff]  }
   0x7   :  { %908 = vmatpush3.bf16.msra.mxu0 %v1040_v2  ;;  %1030 = vmatpush3.bf16.msra.mxu1 %v1040_v2  ;;  %v69_v12 = vadd.f32 %v68_v10, %v1118_v9  ;;  %v1177_v26 = vld [vmem:[%s2071_s0 + $0x50] sm:$0xff]  ;;  %v1186_v29 = vld [vmem:[%s2071_s0 + $0x58] sm:$0xff]  ;;  %v1194_v31 = vld [vmem:[%s2071_s0 + $0x60] sm:$0xff] }
   0x8   :  { %909 = vmatprep.subr.bf16.mxu0 %v2075_v0  ;;  %1023 = vmatprep.subr.bf16.mxu1 %v2075_v0  ;;  %v1200_v33 = vld [vmem:[%s2071_s0 + $0x68] sm:$0xff]  ;;  %v1206_v35 = vld [vmem:[%s2071_s0 + $0x70] sm:$0xff]  ;;  %v1212_v37 = vld [vmem:[%s2071_s0 + $0x78] sm:$0xff] }
   0x9   :  { %v70_v15 = vadd.f32 %v69_v12, %v1126_v11  ;;  %v1218_v39 = vld [vmem:[%s2071_s0 + $0x80] sm:$0xff]  ;;  %v1224_v41 = vld [vmem:[%s2071_s0 + $0x88] sm:$0xff]  ;;  %v1230_v43 = vld [vmem:[%s2071_s0 + $0x90] sm:$0xff] }
   0xa   :  { %v1236_v45 = vld [vmem:[%s2071_s0 + $0x98] sm:$0xff]  ;;  %v1242_v47 = vld [vmem:[%s2071_s0 + $0xa0] sm:$0xff]  ;;  %v1248_v49 = vld [vmem:[%s2071_s0 + $0xa8] sm:$0xff] }
   0xb   :  { %910 = vmatpush3.bf16.msra.mxu0 %v1041_v3  ;;  %1031 = vmatpush3.bf16.msra.mxu1 %v1041_v3  ;;  %v71_v17 = vadd.f32 %v70_v15, %v1135_v14  ;;  %v1254_v51 = vld [vmem:[%s2071_s0 + $0xb0] sm:$0xff]  ;;  %v1260_v53 = vld [vmem:[%s2071_s0 + $0xb8] sm:$0xff]  ;;  %v1266_v55 = vld [vmem:[%s2071_s0 + $0xc0] sm:$0xff] }
   0xc   :  { %911 = vmatprep.subr.bf16.mxu0 %v2075_v0  ;;  %1024 = vmatprep.subr.bf16.mxu1 %v2075_v0  ;;  %v1272_v57 = vld [vmem:[%s2071_s0 + $0xc8] sm:$0xff]  ;;  %v1278_v59 = vld [vmem:[%s2071_s0 + $0xd0] sm:$0xff]  ;;  %v45_v61 = vld [vmem:[%s2071_s0 + $0xd8] sm:$0xff] }
   0xd   :  { %v72_v20 = vadd.f32 %v71_v17, %v1143_v16  ;;  %v46_v63 = vld [vmem:[%s2071_s0 + $0xe0] sm:$0xff]  ;;  %v47_v2 = vld [vmem:[%s2071_s0 + $0xe8] sm:$0xff]  ;;  %v48_v7 = vld [vmem:[%s2071_s0 + $0xf0] sm:$0xff] }
   0xe   :  { %v49_v10 = vld [vmem:[%s2071_s0 + $0xf8] sm:$0xff]  ;;  %v51_v17 = vld [vmem:[%s2071_s0 + $0x108] sm:$0xff] }
   0xf   :  { %912 = vmatpush3.bf16.msra.mxu0 %v1042_v8  ;;  %1032 = vmatpush3.bf16.msra.mxu1 %v1042_v8  ;;  %v73_v22 = vadd.f32 %v72_v20, %v1152_v19  ;;  %v52_v20 = vld [vmem:[%s2071_s0 + $0x110] sm:$0xff] }
  0x10   :  { %913 = vmatprep.subr.bf16.mxu0 %v2075_v0  ;;  %1025 = vmatprep.subr.bf16.mxu1 %v2075_v0 }
  0x11   :  { %v74_v25 = vadd.f32 %v73_v22, %v1160_v21 }
  0x13   :  { %914 = vmatpush3.bf16.msra.mxu0 %v1043_v13  ;;  %1033 = vmatpush3.bf16.msra.mxu1 %v1043_v13  ;;  %v75_v27 = vadd.f32 %v74_v25, %v1169_v24  ;;  %v50_v13 = vld [vmem:[%s2071_s0 + $0x100] sm:$0xff] }
  0x14   :  { %915 = vmatprep.subr.bf16.mxu0 %v2075_v0  ;;  %1026 = vmatprep.subr.bf16.mxu1 %v2075_v0 }
  0x15   :  { %v76_v30 = vadd.f32 %v75_v27, %v1177_v26  ;;  %v54_v27 = vld [vmem:[%s2071_s0 + $0x120] sm:$0xff] }
  0x17   :  { %916 = vmatpush3.bf16.msra.mxu0 %v1044_v18  ;;  %1034 = vmatpush3.bf16.msra.mxu1 %v1044_v18  ;;  %v77_v32 = vadd.f32 %v76_v30, %v1186_v29  ;;  %v55_v30 = vld [vmem:[%s2071_s0 + $0x128] sm:$0xff] }
  0x18   :  { %917 = vmatprep.subr.bf16.mxu0 %v2075_v0  ;;  %1027 = vmatprep.subr.bf16.mxu1 %v2075_v0 }
  0x19   :  { %v78_v34 = vadd.f32 %v77_v32, %v1194_v31 }
  0x1b   :  { %918 = vmatpush3.bf16.msra.mxu0 %v1045_v23  ;;  %1035 = vmatpush3.bf16.msra.mxu1 %v1045_v23  ;;  %v79_v36 = vadd.f32 %v78_v34, %v1200_v33  ;;  %v53_v23 = vld [vmem:[%s2071_s0 + $0x118] sm:$0xff]  ;;  %v56_v34 = vld [vmem:[%s2071_s0 + $0x130] sm:$0xff] }
  0x1c   :  { %919 = vmatprep.subr.bf16.mxu0 %v2075_v0  ;;  %1028 = vmatprep.subr.bf16.mxu1 %v2075_v0 }
  0x1d   :  { %v80_v38 = vadd.f32 %v79_v36, %v1206_v35 }
  0x1f   :  { %920 = vmatpush3.bf16.msra.mxu0 %v1046_v28  ;;  %1036 = vmatpush3.bf16.msra.mxu1 %v1046_v28  ;;  %v81_v40 = vadd.f32 %v80_v38, %v1212_v37  ;;  %v57_v38 = vld [vmem:[%s2071_s0 + $0x138] sm:$0xff] }
  0x21   :  { %v82_v42 = vadd.f32 %v81_v40, %v1218_v39 }
  0x23   :  { %v83_v44 = vadd.f32 %v82_v42, %v1224_v41  ;;  %v58_v42 = vld [vmem:[%s2071_s0 + $0x140] sm:$0xff] }
  0x25   :  { %v84_v46 = vadd.f32 %v83_v44, %v1230_v43 }
  0x27   :  { %v85_v48 = vadd.f32 %v84_v46, %v1236_v45  ;;  %v59_v46 = vld [vmem:[%s2071_s0 + $0x148] sm:$0xff] }
  0x29   :  { %v86_v50 = vadd.f32 %v85_v48, %v1242_v47 }
  0x2b   :  { %v87_v52 = vadd.f32 %v86_v50, %v1248_v49  ;;  %v60_v50 = vld [vmem:[%s2071_s0 + $0x150] sm:$0xff] }
  0x2d   :  { %v88_v54 = vadd.f32 %v87_v52, %v1254_v51 }
  0x2f   :  { %v89_v56 = vadd.f32 %v88_v54, %v1260_v53  ;;  %v61_v54 = vld [vmem:[%s2071_s0 + $0x158] sm:$0xff] }
  0x31   :  { %v90_v58 = vadd.f32 %v89_v56, %v1266_v55 }
  0x33   :  { %v91_v60 = vadd.f32 %v90_v58, %v1272_v57  ;;  %v62_v58 = vld [vmem:[%s2071_s0 + $0x160] sm:$0xff] }
  0x35   :  { %v92_v62 = vadd.f32 %v91_v60, %v1278_v59 }
  0x37   :  { %v93_v1 = vadd.f32 %v92_v62, %v45_v61  ;;  %v63_v62 = vld [vmem:[%s2071_s0 + $0x168] sm:$0xff] }
  0x39   :  { %v94_v3 = vadd.f32 %v93_v1, %v46_v63 }
  0x3b   :  { %v95_v8 = vadd.f32 %v94_v3, %v47_v2  ;;  %v64_v3 = vld [vmem:[%s2071_s0 + $0x170] sm:$0xff] }
  0x3d   :  { %v96_v12 = vadd.f32 %v95_v8, %v48_v7 }
  0x3f   :  { %v97_v15 = vadd.f32 %v96_v12, %v49_v10  ;;  %v65_v12 = vld [vmem:[%s2071_s0 + $0x178] sm:$0xff] }
  0x41   :  { %v98_v18 = vadd.f32 %v97_v15, %v50_v13 }
  0x43   :  { %v99_v22 = vadd.f32 %v98_v18, %v51_v17  ;;  %v66_v18 = vld [vmem:[%s2071_s0 + $0x180] sm:$0xff] }
  0x45   :  { %v100_v25 = vadd.f32 %v99_v22, %v52_v20 }
  0x47   :  { %v101_v28 = vadd.f32 %v100_v25, %v53_v23 }
  0x49   :  { %v102_v32 = vadd.f32 %v101_v28, %v54_v27 }
  0x4b   :  { %v103_v36 = vadd.f32 %v102_v32, %v55_v30 }
  0x4d   :  { %v104_v40 = vadd.f32 %v103_v36, %v56_v34 }
  0x4f   :  { %v105_v44 = vadd.f32 %v104_v40, %v57_v38 }
  0x51   :  { %v106_v48 = vadd.f32 %v105_v44, %v58_v42 }
  0x53   :  { %v107_v52 = vadd.f32 %v106_v48, %v59_v46 }
  0x55   :  { %v108_v56 = vadd.f32 %v107_v52, %v60_v50 }
  0x57   :  { %v109_v60 = vadd.f32 %v108_v56, %v61_v54 }
  0x59   :  { %v110_v1 = vadd.f32 %v109_v60, %v62_v58 }
  0x5b   :  { %v111_v8 = vadd.f32 %v110_v1, %v63_v62 }
  0x5d   :  { %v112_v15 = vadd.f32 %v111_v8, %v64_v3 }
  0x5f   :  { %v113_v22 = vadd.f32 %v112_v15, %v65_v12 }
  0x61   :  { %v114_v25 = vadd.f32 %v113_v22, %v66_v18 }
  0x63   :  { %v115_v28 = vrot.slane %v114_v25, 4 }
  0x65   :  { %v116_v32 = vadd.f32 %v115_v28, %v114_v25 }
  0x67   :  { %v117_v36 = vrot.slane %v116_v32, 2 }
  0x69   :  { %v118_v40 = vadd.f32 %v117_v36, %v116_v32 }
  0x6b   :  { %v119_v44 = vrot.slane %v118_v40, 1 }
  0x6d   :  { %v120_v48 = vadd.f32 %v119_v44, %v118_v40 }
  0x6f   :  { %v1348_v52 = vmul.f32 0.0025510204, %v120_v48 }
  0x71   :  { %v1351_v56 = vsub.f32 %v45_v61, %v1348_v52  ;;  %v1354_v60 = vsub.f32 %v46_v63, %v1348_v52  ;;  %v1357_v1 = vsub.f32 %v47_v2, %v1348_v52  ;;  %v1360_v8 = vsub.f32 %v48_v7, %v1348_v52 }
  0x72   :  { %v1363_v15 = vsub.f32 %v49_v10, %v1348_v52  ;;  %v1366_v22 = vsub.f32 %v50_v13, %v1348_v52  ;;  %v1369_v25 = vsub.f32 %v51_v17, %v1348_v52  ;;  %v1372_v61 = vsub.f32 %v52_v20, %v1348_v52 }
  0x73   :  { %v1375_v63 = vsub.f32 %v53_v23, %v1348_v52  ;;  %v1378_v2 = vsub.f32 %v54_v27, %v1348_v52  ;;  %v1381_v7 = vsub.f32 %v55_v30, %v1348_v52  ;;  %v1384_v10 = vsub.f32 %v56_v34, %v1348_v52 }
  0x74   :  { %v1387_v13 = vsub.f32 %v57_v38, %v1348_v52  ;;  %v1390_v17 = vsub.f32 %v58_v42, %v1348_v52  ;;  %v1393_v20 = vsub.f32 %v59_v46, %v1348_v52  ;;  %v1396_v23 = vsub.f32 %v60_v50, %v1348_v52 }
  0x75   :  { %v1399_v27 = vsub.f32 %v61_v54, %v1348_v52  ;;  %v1402_v30 = vsub.f32 %v62_v58, %v1348_v52  ;;  %v1405_v34 = vsub.f32 %v63_v62, %v1348_v52  ;;  %v1408_v38 = vsub.f32 %v64_v3, %v1348_v52 }
  0x76   :  { %v1411_v42 = vsub.f32 %v65_v12, %v1348_v52  ;;  %v1414_v46 = vsub.f32 %v66_v18, %v1348_v52  ;;  %v1418_v50 = vsub.f32 %v1098_v4, %v1348_v52  ;;  %v1422_v54 = vsub.f32 %v1103_v5, %v1348_v52 }
  0x77   :  { %v1426_v58 = vsub.f32 %v1108_v6, %v1348_v52  ;;  %v1430_v62 = vsub.f32 %v1118_v9, %v1348_v52  ;;  %v1438_v4 = vsub.f32 %v1126_v11, %v1348_v52  ;;  %v1444_v6 = vsub.f32 %v1135_v14, %v1348_v52 }
  0x78   :  { %v172_v3 = vmul.f32 %v1418_v50, %v1418_v50  ;;  %v173_v12 = vmul.f32 %v1422_v54, %v1422_v54  ;;  %v1450_v28 = vsub.f32 %v1143_v16, %v1348_v52  ;;  %v1456_v36 = vsub.f32 %v1152_v19, %v1348_v52 }
  0x79   :  { %v174_v5 = vmul.f32 %v1426_v58, %v1426_v58  ;;  %v175_v9 = vmul.f32 %v1430_v62, %v1430_v62  ;;  %v176_v32 = vmul.f32 %v1438_v4, %v1438_v4  ;;  %v177_v14 = vmul.f32 %v1444_v6, %v1444_v6 }
  0x7a   :  { %v221_v18 = vadd.f32 %v173_v12, %v172_v3  ;;  %v1462_v44 = vsub.f32 %v1160_v21, %v1348_v52  ;;  %v178_v16 = vmul.f32 %v1450_v28, %v1450_v28  ;;  %v1468_v3 = vsub.f32 %v1169_v24, %v1348_v52 }
  0x7b   :  { %v179_v19 = vmul.f32 %v1456_v36, %v1456_v36 }
  0x7c   :  { %v222_v11 = vadd.f32 %v221_v18, %v174_v5  ;;  %v1474_v5 = vsub.f32 %v1177_v26, %v1348_v52  ;;  %v180_v21 = vmul.f32 %v1462_v44, %v1462_v44  ;;  %v1480_v18 = vsub.f32 %v1186_v29, %v1348_v52 }
  0x7d   :  { %v181_v24 = vmul.f32 %v1468_v3, %v1468_v3 }
  0x7e   :  { %v223_v40 = vadd.f32 %v222_v11, %v175_v9  ;;  %v1486_v11 = vsub.f32 %v1194_v31, %v1348_v52  ;;  %v182_v26 = vmul.f32 %v1474_v5, %v1474_v5  ;;  %v183_v29 = vmul.f32 %v1480_v18, %v1480_v18 }
  0x80   :  { %v224_v48 = vadd.f32 %v223_v40, %v176_v32  ;;  %v1492_v40 = vsub.f32 %v1200_v33, %v1348_v52  ;;  %v184_v31 = vmul.f32 %v1486_v11, %v1486_v11 }
  0x82   :  { %v225_v12 = vadd.f32 %v224_v48, %v177_v14  ;;  %v1498_v48 = vsub.f32 %v1206_v35, %v1348_v52  ;;  %v185_v33 = vmul.f32 %v1492_v40, %v1492_v40 }
  0x84   :  { %v226_v9 = vadd.f32 %v225_v12, %v178_v16  ;;  %v1504_v12 = vsub.f32 %v1212_v37, %v1348_v52  ;;  %v186_v35 = vmul.f32 %v1498_v48, %v1498_v48 }
  0x86   :  { %v227_v32 = vadd.f32 %v226_v9, %v179_v19  ;;  %v1510_v9 = vsub.f32 %v1218_v39, %v1348_v52  ;;  %v187_v37 = vmul.f32 %v1504_v12, %v1504_v12 }
  0x88   :  { %v228_v14 = vadd.f32 %v227_v32, %v180_v21  ;;  %v1516_v32 = vsub.f32 %v1224_v41, %v1348_v52  ;;  %v188_v39 = vmul.f32 %v1510_v9, %v1510_v9 }
  0x8a   :  { %v229_v16 = vadd.f32 %v228_v14, %v181_v24  ;;  %v1522_v14 = vsub.f32 %v1230_v43, %v1348_v52  ;;  %v189_v41 = vmul.f32 %v1516_v32, %v1516_v32 }
  0x8c   :  { %v230_v19 = vadd.f32 %v229_v16, %v182_v26  ;;  %v1528_v16 = vsub.f32 %v1236_v45, %v1348_v52  ;;  %v190_v43 = vmul.f32 %v1522_v14, %v1522_v14 }
  0x8e   :  { %v231_v21 = vadd.f32 %v230_v19, %v183_v29  ;;  %v1534_v19 = vsub.f32 %v1242_v47, %v1348_v52  ;;  %v191_v45 = vmul.f32 %v1528_v16, %v1528_v16 }
  0x90   :  { %v232_v24 = vadd.f32 %v231_v21, %v184_v31  ;;  %v1540_v21 = vsub.f32 %v1248_v49, %v1348_v52  ;;  %v192_v47 = vmul.f32 %v1534_v19, %v1534_v19 }
  0x92   :  { %v233_v26 = vadd.f32 %v232_v24, %v185_v33  ;;  %v1546_v24 = vsub.f32 %v1254_v51, %v1348_v52  ;;  %v193_v49 = vmul.f32 %v1540_v21, %v1540_v21 }
  0x94   :  { %v234_v29 = vadd.f32 %v233_v26, %v186_v35  ;;  %2081 = vst [vmem:[#allocation2_spill] sm:$0xff] %v1546_v24  ;;  %v1552_v26 = vsub.f32 %v1260_v53, %v1348_v52  ;;  %v194_v51 = vmul.f32 %v1546_v24, %v1546_v24 }
  0x96   :  { %v235_v31 = vadd.f32 %v234_v29, %v187_v37  ;;  %2082 = vst [vmem:[#allocation3_spill] sm:$0xff] %v1552_v26  ;;  %v1558_v29 = vsub.f32 %v1266_v55, %v1348_v52  ;;  %v195_v53 = vmul.f32 %v1552_v26, %v1552_v26 }
  0x98   :  { %v236_v33 = vadd.f32 %v235_v31, %v188_v39  ;;  %2083 = vst [vmem:[#allocation4_spill] sm:$0xff] %v1558_v29  ;;  %v1564_v31 = vsub.f32 %v1272_v57, %v1348_v52  ;;  %v196_v55 = vmul.f32 %v1558_v29, %v1558_v29 }
  0x9a   :  { %v237_v35 = vadd.f32 %v236_v33, %v189_v41  ;;  %2084 = vst [vmem:[#allocation5_spill] sm:$0xff] %v1564_v31  ;;  %v1570_v33 = vsub.f32 %v1278_v59, %v1348_v52  ;;  %v200_v59 = vmul.f32 %v1354_v60, %v1354_v60 }
  0x9c   :  { %v238_v37 = vadd.f32 %v237_v35, %v190_v43  ;;  %v197_v35 = vmul.f32 %v1564_v31, %v1564_v31  ;;  %v198_v57 = vmul.f32 %v1570_v33, %v1570_v33 }
  0x9e   :  { %v239_v39 = vadd.f32 %v238_v37, %v191_v45 }
  0xa0   :  { %v240_v41 = vadd.f32 %v239_v39, %v192_v47  ;;  %v199_v39 = vmul.f32 %v1351_v56, %v1351_v56 }
  0xa2   :  { %v241_v43 = vadd.f32 %v240_v41, %v193_v49  ;;  %v201_v41 = vmul.f32 %v1357_v1, %v1357_v1 }
  0xa4   :  { %v242_v45 = vadd.f32 %v241_v43, %v194_v51  ;;  %v202_v43 = vmul.f32 %v1360_v8, %v1360_v8 }
  0xa6   :  { %v243_v47 = vadd.f32 %v242_v45, %v195_v53  ;;  %v203_v45 = vmul.f32 %v1363_v15, %v1363_v15 }
  0xa8   :  { %v244_v37 = vadd.f32 %v243_v47, %v196_v55  ;;  %v204_v47 = vmul.f32 %v1366_v22, %v1366_v22 }
  0xaa   :  { %v245_v49 = vadd.f32 %v244_v37, %v197_v35  ;;  %v205_v37 = vmul.f32 %v1369_v25, %v1369_v25 }
  0xac   :  { %v246_v52 = vadd.f32 %v245_v49, %v198_v57  ;;  %v206_v49 = vmul.f32 %v1372_v61, %v1372_v61 }
  0xae   :  { %v247_v51 = vadd.f32 %v246_v52, %v199_v39  ;;  %v207_v52 = vmul.f32 %v1375_v63, %v1375_v63 }
  0xb0   :  { %v248_v53 = vadd.f32 %v247_v51, %v200_v59  ;;  %v208_v51 = vmul.f32 %v1378_v2, %v1378_v2 }
  0xb2   :  { %v249_v55 = vadd.f32 %v248_v53, %v201_v41  ;;  %v209_v53 = vmul.f32 %v1381_v7, %v1381_v7 }
  0xb4   :  { %v250_v35 = vadd.f32 %v249_v55, %v202_v43  ;;  %v210_v55 = vmul.f32 %v1384_v10, %v1384_v10 }
  0xb6   :  { %v251_v57 = vadd.f32 %v250_v35, %v203_v45  ;;  %v211_v35 = vmul.f32 %v1387_v13, %v1387_v13 }
  0xb8   :  { %v252_v39 = vadd.f32 %v251_v57, %v204_v47  ;;  %v212_v57 = vmul.f32 %v1390_v17, %v1390_v17 }
  0xba   :  { %v253_v59 = vadd.f32 %v252_v39, %v205_v37  ;;  %v213_v39 = vmul.f32 %v1393_v20, %v1393_v20 }
  0xbc   :  { %v254_v41 = vadd.f32 %v253_v59, %v206_v49  ;;  %v214_v59 = vmul.f32 %v1396_v23, %v1396_v23 }
  0xbe   :  { %v255_v43 = vadd.f32 %v254_v41, %v207_v52  ;;  %v215_v41 = vmul.f32 %v1399_v27, %v1399_v27 }
  0xc0   :  { %v256_v45 = vadd.f32 %v255_v43, %v208_v51  ;;  %v216_v43 = vmul.f32 %v1402_v30, %v1402_v30 }
  0xc2   :  { %v257_v47 = vadd.f32 %v256_v45, %v209_v53  ;;  %v217_v45 = vmul.f32 %v1405_v34, %v1405_v34 }
  0xc4   :  { %v258_v37 = vadd.f32 %v257_v47, %v210_v55  ;;  %v218_v47 = vmul.f32 %v1408_v38, %v1408_v38 }
  0xc6   :  { %v259_v49 = vadd.f32 %v258_v37, %v211_v35  ;;  %v219_v37 = vmul.f32 %v1411_v42, %v1411_v42 }
  0xc8   :  { %v260_v52 = vadd.f32 %v259_v49, %v212_v57  ;;  %v220_v49 = vmul.f32 %v1414_v46, %v1414_v46 }
  0xca   :  { %v261_v51 = vadd.f32 %v260_v52, %v213_v39 }
  0xcc   :  { %v262_v53 = vadd.f32 %v261_v51, %v214_v59 }
  0xce   :  { %v263_v55 = vadd.f32 %v262_v53, %v215_v41 }
  0xd0   :  { %v264_v35 = vadd.f32 %v263_v55, %v216_v43 }
  0xd2   :  { %v265_v57 = vadd.f32 %v264_v35, %v217_v45  ;;  %v1627_v45 = vld [vmem:[%s2072_s1] ss:$0 sm:$0xff] }
  0xd4   :  { %v266_v39 = vadd.f32 %v265_v57, %v218_v47 }
  0xd6   :  { %v267_v52 = vadd.f32 %v266_v39, %v219_v37 }
  0xd8   :  { %v268_v0 = vadd.f32 %v267_v52, %v220_v49 }
  0xda   :  { %v269_v31 = vrot.slane %v268_v0, 4 }
  0xdc   :  { %v270_v59 = vadd.f32 %v269_v31, %v268_v0 }
  0xde   :  { %v271_v51 = vrot.slane %v270_v59, 2 }
  0xe0   :  { %v272_v29 = vadd.f32 %v271_v51, %v270_v59 }
  0xe2   :  { %v273_v26 = vrot.slane %v272_v29, 1 }
  0xe4   :  { %v274_v41 = vadd.f32 %v273_v26, %v272_v29 }
  0xe6   :  { %v275_v53 = vmul.f32 0.0025510204, %v274_v41 }
  0xe8   :  { %v276_v24 = vadd.f32 1e-05, %v275_v53 }
  0xea   :  { %1047 = vrsqrt.f32 %v276_v24  ;;  %v1640_v24 = vld [vmem:[%s2073_s2] ss:$0 sm:$0xff] }
  0xf4   :  { %v1622_v43 = vpop.eup %1047 }
  0xf5   :  { %v278_v55 = vmul.f32 %v1622_v43, %v1418_v50  ;;  %v279_v0 = vmul.f32 %v1622_v43, %v1422_v54  ;;  %v304_v31 = vmul.f32 %v1622_v43, %v1570_v33  ;;  %v305_v26 = vmul.f32 %v1622_v43, %v1351_v56 }
  0xf6   :  { %v280_v29 = vmul.f32 %v1622_v43, %v1426_v58  ;;  %v281_v50 = vmul.f32 %v1622_v43, %v1430_v62  ;;  %v306_v54 = vmul.f32 %v1622_v43, %v1354_v60  ;;  %v307_v33 = vmul.f32 %v1622_v43, %v1357_v1 }
  0xf7   :  { %v334_v47 = vmul.f32 %v1627_v45, %v278_v55  ;;  %v335_v56 = vmul.f32 %v1627_v45, %v279_v0  ;;  %v360_v35 = vmul.f32 %v1627_v45, %v304_v31  ;;  %v361_v37 = vmul.f32 %v1627_v45, %v305_v26 }
  0xf8   :  { %v336_v57 = vmul.f32 %v1627_v45, %v280_v29  ;;  %v337_v58 = vmul.f32 %v1627_v45, %v281_v50  ;;  %v362_v62 = vmul.f32 %v1627_v45, %v306_v54  ;;  %v363_v49 = vmul.f32 %v1627_v45, %v307_v33 }
  0xf9   :  { %v390_v60 = vadd.f32 %v1640_v24, %v334_v47  ;;  %v391_v1 = vadd.f32 %v1640_v24, %v335_v56  ;;  %v416_v39 = vadd.f32 %v1640_v24, %v360_v35  ;;  %v417_v52 = vadd.f32 %v1640_v24, %v361_v37 }
  0xfa   :  { %v392_v59 = vadd.f32 %v1640_v24, %v336_v57  ;;  %v393_v51 = vadd.f32 %v1640_v24, %v337_v58  ;;  %v418_v41 = vadd.f32 %v1640_v24, %v362_v62  ;;  %v419_v53 = vadd.f32 %v1640_v24, %v363_v49 }
  0xfb   :  { %v439_v55 = vmax.f32 %v390_v60, 0.0  ;;  %v440_v0 = vmax.f32 %v391_v1, 0.0  ;;  %v465_v31 = vmax.f32 %v416_v39, 0.0  ;;  %v466_v26 = vmax.f32 %v417_v52, 0.0 }
  0xfc   :  { %v441_v29 = vmax.f32 %v392_v59, 0.0  ;;  %v282_v33 = vmul.f32 %v1622_v43, %v1438_v4  ;;  %v283_v47 = vmul.f32 %v1622_v43, %v1444_v6  ;;  %v442_v56 = vmax.f32 %v393_v51, 0.0 }
  0xfd   :  { %v488_v50 = vpack.c.bf16 %v440_v0, %v439_v55  ;;  %v501_v54 = vpack.c.bf16 %v466_v26, %v465_v31  ;;  %v467_v35 = vmax.f32 %v418_v41, 0.0  ;;  %v308_v37 = vmul.f32 %v1622_v43, %v1360_v8 }
  0xfe   :  { %v309_v57 = vmul.f32 %v1622_v43, %v1363_v15  ;;  %v468_v58 = vmax.f32 %v419_v53, 0.0  ;;  %v338_v62 = vmul.f32 %v1627_v45, %v282_v33  ;;  %v339_v49 = vmul.f32 %v1627_v45, %v283_v47 }
  0xff   :  { %922 = vmatmul.mubr.bf16.vlgmr.msra.gmra.mrb[0].mxu0 %v488_v50  ;;  %974 = vmatmul.mubr.bf16.vlgmr.msra.gmra.mrb[0].mxu1 %v501_v54  ;;  %v284_v4 = vmul.f32 %v1622_v43, %v1450_v28  ;;  %v2085_v60 = vmov 0.0   ;;  %v364_v8 = vmul.f32 %v1627_v45, %v308_v37  ;;  %v285_v6 = vmul.f32 %v1622_v43, %v1456_v36 }
 0x100   :  { %925 = vmatprep.mubr.msk.bf16.mxu0 %vm1050_vm0, %v2085_v60  ;;  %977 = vmatprep.mubr.msk.bf16.mxu1 %vm1050_vm0, %v2085_v60  ;;  %v365_v15 = vmul.f32 %v1627_v45, %v309_v57  ;;  %v394_v1 = vadd.f32 %v1640_v24, %v338_v62  ;;  %v395_v39 = vadd.f32 %v1640_v24, %v339_v49 }
 0x101   :  { %v340_v52 = vmul.f32 %v1627_v45, %v284_v4  ;;  %v310_v28 = vmul.f32 %v1622_v43, %v1366_v22  ;;  %v420_v59 = vadd.f32 %v1640_v24, %v364_v8  ;;  %v341_v51 = vmul.f32 %v1627_v45, %v285_v6 }
 0x102   :  { %v311_v41 = vmul.f32 %v1622_v43, %v1369_v25  ;;  %v489_v53 = vpack.c.bf16 %v442_v56, %v441_v29  ;;  %v502_v55 = vpack.c.bf16 %v468_v58, %v467_v35  ;;  %v421_v36 = vadd.f32 %v1640_v24, %v365_v15 }
 0x103   :  { %v366_v0 = vmul.f32 %v1627_v45, %v310_v28  ;;  %v443_v31 = vmax.f32 %v394_v1, 0.0  ;;  %v444_v26 = vmax.f32 %v395_v39, 0.0  ;;  %v396_v50 = vadd.f32 %v1640_v24, %v340_v52 }
 0x104   :  { %v367_v54 = vmul.f32 %v1627_v45, %v311_v41  ;;  %v397_v22 = vadd.f32 %v1640_v24, %v341_v51  ;;  %v286_v33 = vmul.f32 %v1622_v43, %v1462_v44  ;;  %v469_v47 = vmax.f32 %v420_v59, 0.0 }
 0x105   :  { %v422_v25 = vadd.f32 %v1640_v24, %v366_v0  ;;  %v287_v56 = vmul.f32 %v1622_v43, %v1468_v3  ;;  %v470_v35 = vmax.f32 %v421_v36, 0.0  ;;  %v312_v57 = vmul.f32 %v1622_v43, %v1372_v61 }
 0x106   :  { %v423_v29 = vadd.f32 %v1640_v24, %v367_v54  ;;  %v342_v37 = vmul.f32 %v1627_v45, %v286_v33  ;;  %v313_v58 = vmul.f32 %v1622_v43, %v1375_v63  ;;  %v490_v44 = vpack.c.bf16 %v444_v26, %v443_v31 }
 0x107   :  { %926 = vmatmul.mubr.bf16.gmra.mrb[4].mxu0 %v489_v53  ;;  %978 = vmatmul.mubr.bf16.gmra.mrb[4].mxu1 %v502_v55  ;;  %v445_v62 = vmax.f32 %v396_v50, 0.0  ;;  %v343_v3 = vmul.f32 %v1627_v45, %v287_v56  ;;  %v288_v49 = vmul.f32 %v1622_v43, %v1474_v5  ;;  %v446_v4 = vmax.f32 %v397_v22, 0.0 }
 0x108   :  { %929 = vmatprep.mubr.msk.bf16.mxu0 %vm1050_vm0, %v2085_v60  ;;  %981 = vmatprep.mubr.msk.bf16.mxu1 %vm1050_vm0, %v2085_v60  ;;  %v368_v8 = vmul.f32 %v1627_v45, %v312_v57  ;;  %v369_v61 = vmul.f32 %v1627_v45, %v313_v58  ;;  %v289_v63 = vmul.f32 %v1622_v43, %v1480_v18  ;;  %v471_v15 = vmax.f32 %v422_v25, 0.0 }
 0x109   :  { %v472_v6 = vmax.f32 %v423_v29, 0.0  ;;  %v344_v1 = vmul.f32 %v1627_v45, %v288_v49  ;;  %v314_v39 = vmul.f32 %v1622_v43, %v1378_v2  ;;  %v503_v52 = vpack.c.bf16 %v470_v35, %v469_v47 }
 0x10a   :  { %v398_v28 = vadd.f32 %v1640_v24, %v342_v37  ;;  %v399_v5 = vadd.f32 %v1640_v24, %v343_v3  ;;  %v345_v59 = vmul.f32 %v1627_v45, %v289_v63  ;;  %v424_v51 = vadd.f32 %v1640_v24, %v368_v8 }
 0x10b   :  { %v315_v41 = vmul.f32 %v1622_v43, %v1381_v7  ;;  %v370_v18 = vmul.f32 %v1627_v45, %v314_v39  ;;  %v491_v53 = vpack.c.bf16 %v446_v4, %v445_v62  ;;  %v425_v55 = vadd.f32 %v1640_v24, %v369_v61 }
 0x10c   :  { %v400_v36 = vadd.f32 %v1640_v24, %v344_v1  ;;  %v290_v2 = vmul.f32 %v1622_v43, %v1486_v11  ;;  %v504_v0 = vpack.c.bf16 %v472_v6, %v471_v15  ;;  %v401_v31 = vadd.f32 %v1640_v24, %v345_v59 }
 0x10d   :  { %v371_v26 = vmul.f32 %v1627_v45, %v315_v41  ;;  %v426_v50 = vadd.f32 %v1640_v24, %v370_v18  ;;  %v447_v7 = vmax.f32 %v398_v28, 0.0  ;;  %v448_v54 = vmax.f32 %v399_v5, 0.0 }
 0x10e   :  { %v291_v22 = vmul.f32 %v1622_v43, %v1492_v40  ;;  %v346_v33 = vmul.f32 %v1627_v45, %v290_v2  ;;  %v473_v11 = vmax.f32 %v424_v51, 0.0  ;;  %v316_v25 = vmul.f32 %v1622_v43, %v1384_v10 }
 0x10f   :  { %930 = vmatmul.mubr.bf16.gmra.mrb[8].mxu0 %v490_v44  ;;  %982 = vmatmul.mubr.bf16.gmra.mrb[8].mxu1 %v503_v52  ;;  %v427_v47 = vadd.f32 %v1640_v24, %v371_v26  ;;  %v317_v29 = vmul.f32 %v1622_v43, %v1387_v13  ;;  %v474_v56 = vmax.f32 %v425_v55, 0.0  ;;  %v449_v35 = vmax.f32 %v400_v36, 0.0 }
 0x110   :  { %933 = vmatprep.mubr.msk.bf16.mxu0 %vm1050_vm0, %v2085_v60  ;;  %985 = vmatprep.mubr.msk.bf16.mxu1 %vm1050_vm0, %v2085_v60  ;;  %v347_v40 = vmul.f32 %v1627_v45, %v291_v22  ;;  %v292_v37 = vmul.f32 %v1622_v43, %v1498_v48  ;;  %v450_v57 = vmax.f32 %v401_v31, 0.0  ;;  %v475_v58 = vmax.f32 %v426_v50, 0.0 }
 0x111   :  { %v372_v44 = vmul.f32 %v1627_v45, %v316_v25  ;;  %v373_v62 = vmul.f32 %v1627_v45, %v317_v29  ;;  %v476_v3 = vmax.f32 %v427_v47, 0.0  ;;  %v1757_v49 = vadd.f32 %v1640_v24, %v346_v33 }
 0x112   :  { %v293_v10 = vmul.f32 %v1622_v43, %v1504_v12  ;;  %v348_v13 = vmul.f32 %v1627_v45, %v292_v37  ;;  %v1763_v4 = vadd.f32 %v1640_v24, %v347_v40  ;;  %v492_v8 = vpack.c.bf16 %v448_v54, %v447_v7 }
 0x113   :  { %v1766_v48 = vadd.f32 %v1640_v24, %v372_v44  ;;  %v318_v61 = vmul.f32 %v1622_v43, %v1390_v17  ;;  %v505_v63 = vpack.c.bf16 %v474_v56, %v473_v11  ;;  %v1770_v15 = vpack.c.bf16 %v450_v57, %v449_v35 }
 0x114   :  { %v1773_v6 = vadd.f32 %v1640_v24, %v373_v62  ;;  %v294_v12 = vmul.f32 %v1622_v43, %v1510_v9  ;;  %v1777_v1 = vpack.c.bf16 %v476_v3, %v475_v58  ;;  %v451_v39 = vmax.f32 %v1757_v49, 0.0 }
 0x115   :  { %v349_v52 = vmul.f32 %v1627_v45, %v293_v10  ;;  %v1782_v28 = vadd.f32 %v1640_v24, %v348_v13  ;;  %v452_v17 = vmax.f32 %v1763_v4, 0.0  ;;  %v319_v9 = vmul.f32 %v1622_v43, %v1393_v20 }
 0x116   :  { %v295_v5 = vmul.f32 %v1622_v43, %v1516_v32  ;;  %v350_v59 = vmul.f32 %v1627_v45, %v294_v12  ;;  %v477_v51 = vmax.f32 %v1766_v48, 0.0  ;;  %v1796_v41 = vmul.f32 %v1627_v45, %v318_v61 }
 0x117   :  { %934 = vmatmul.mubr.bf16.gmra.mrb[12].mxu0 %v491_v53  ;;  %986 = vmatmul.mubr.bf16.gmra.mrb[12].mxu1 %v504_v0  ;;  %v320_v18 = vmul.f32 %v1622_v43, %v1396_v23  ;;  %v321_v53 = vmul.f32 %v1622_v43, %v1399_v27  ;;  %v478_v55 = vmax.f32 %v1773_v6, 0.0  ;;  %v296_v32 = vmul.f32 %v1622_v43, %v1522_v14 }
 0x118   :  { %937 = vmatprep.mubr.msk.bf16.mxu0 %vm1050_vm0, %v2085_v60  ;;  %989 = vmatprep.mubr.msk.bf16.mxu1 %vm1050_vm0, %v2085_v60  ;;  %v351_v20 = vmul.f32 %v1627_v45, %v295_v5  ;;  %v406_v36 = vadd.f32 %v1640_v24, %v350_v59  ;;  %v1808_v2 = vadd.f32 %v1640_v24, %v349_v52  ;;  %v2086_v52 = vld [vmem:[#allocation2_spill] sm:$0xff] }
 0x119   :  { %v376_v0 = vmul.f32 %v1627_v45, %v320_v18  ;;  %v377_v31 = vmul.f32 %v1627_v45, %v321_v53  ;;  %v297_v23 = vmul.f32 %v1622_v43, %v1528_v16  ;;  %v352_v50 = vmul.f32 %v1627_v45, %v296_v32  ;;  %v2087_v18 = vld [vmem:[#allocation3_spill] sm:$0xff] }
 0x11a   :  { %v407_v27 = vadd.f32 %v1640_v24, %v351_v20  ;;  %v455_v26 = vmax.f32 %v406_v36, 0.0  ;;  %v322_v7 = vmul.f32 %v1622_v43, %v1402_v30  ;;  %v1819_v14 = vmul.f32 %v1627_v45, %v319_v9 }
 0x11b   :  { %v432_v54 = vadd.f32 %v1640_v24, %v376_v0  ;;  %v433_v22 = vadd.f32 %v1640_v24, %v377_v31  ;;  %v353_v33 = vmul.f32 %v1627_v45, %v297_v23  ;;  %v408_v16 = vadd.f32 %v1640_v24, %v352_v50 }
 0x11c   :  { %v456_v11 = vmax.f32 %v407_v27, 0.0  ;;  %v323_v47 = vmul.f32 %v1622_v43, %v1405_v34  ;;  %v378_v25 = vmul.f32 %v1627_v45, %v322_v7  ;;  %v298_v35 = vmul.f32 %v1622_v43, %v1534_v19  ;;  %v2088_v7 = vld [vmem:[#allocation4_spill] sm:$0xff] }
 0x11d   :  { %v481_v30 = vmax.f32 %v432_v54, 0.0  ;;  %v482_v29 = vmax.f32 %v433_v22, 0.0  ;;  %v409_v56 = vadd.f32 %v1640_v24, %v353_v33  ;;  %v457_v34 = vmax.f32 %v408_v16, 0.0  ;;  %v2089_v33 = vld [vmem:[#allocation5_spill] sm:$0xff] }
 0x11e   :  { %v1835_v40 = vpack.c.bf16 %v456_v11, %v455_v26  ;;  %v379_v37 = vmul.f32 %v1627_v45, %v323_v47  ;;  %v434_v57 = vadd.f32 %v1640_v24, %v378_v25  ;;  %v299_v62 = vmul.f32 %v1622_v43, %v1540_v21 }
 0x11f   :  { %938 = vmatmul.mubr.bf16.gmra.mrb[16].mxu0 %v492_v8  ;;  %990 = vmatmul.mubr.bf16.gmra.mrb[16].mxu1 %v505_v63  ;;  %v1839_v58 = vpack.c.bf16 %v482_v29, %v481_v30  ;;  %v458_v44 = vmax.f32 %v409_v56, 0.0  ;;  %v354_v19 = vmul.f32 %v1627_v45, %v298_v35  ;;  %v324_v13 = vmul.f32 %v1622_v43, %v1408_v38 }
 0x120   :  { %941 = vmatprep.mubr.msk.bf16.mxu0 %vm1050_vm0, %v2085_v60  ;;  %993 = vmatprep.mubr.msk.bf16.mxu1 %vm1050_vm0, %v2085_v60  ;;  %v435_v3 = vadd.f32 %v1640_v24, %v379_v37  ;;  %v483_v10 = vmax.f32 %v434_v57, 0.0  ;;  %v325_v8 = vmul.f32 %v1622_v43, %v1411_v42  ;;  %v355_v63 = vmul.f32 %v1627_v45, %v299_v62 }
 0x121   :  { %v1849_v61 = vpack.c.bf16 %v458_v44, %v457_v34  ;;  %v410_v12 = vadd.f32 %v1640_v24, %v354_v19  ;;  %v300_v21 = vmul.f32 %v1622_v43, %v2086_v52  ;;  %v380_v5 = vmul.f32 %v1627_v45, %v324_v13 }
 0x122   :  { %v484_v9 = vmax.f32 %v435_v3, 0.0  ;;  %v381_v59 = vmul.f32 %v1627_v45, %v325_v8  ;;  %v301_v38 = vmul.f32 %v1622_v43, %v2087_v18  ;;  %v411_v53 = vadd.f32 %v1640_v24, %v355_v63 }
 0x123   :  { %v459_v42 = vmax.f32 %v410_v12, 0.0  ;;  %v356_v20 = vmul.f32 %v1627_v45, %v300_v21  ;;  %v326_v36 = vmul.f32 %v1622_v43, %v1414_v46  ;;  %v436_v0 = vadd.f32 %v1640_v24, %v380_v5 }
 0x124   :  { %v510_v32 = vpack.c.bf16 %v484_v9, %v483_v10  ;;  %v437_v31 = vadd.f32 %v1640_v24, %v381_v59  ;;  %v357_v23 = vmul.f32 %v1627_v45, %v301_v38  ;;  %v460_v27 = vmax.f32 %v411_v53, 0.0 }
 0x125   :  { %v412_v26 = vadd.f32 %v1640_v24, %v356_v20  ;;  %v382_v50 = vmul.f32 %v1627_v45, %v326_v36  ;;  %v302_v54 = vmul.f32 %v1622_v43, %v2088_v7  ;;  %v485_v46 = vmax.f32 %v436_v0, 0.0 }
 0x126   :  { %v486_v22 = vmax.f32 %v437_v31, 0.0  ;;  %v498_v11 = vpack.c.bf16 %v460_v27, %v459_v42  ;;  %v494_v30 = vpack.c.bf16 %v452_v17, %v451_v39  ;;  %v430_v34 = vadd.f32 %v1640_v24, %v1796_v41 }
 0x127   :  { %942 = vmatmul.mubr.bf16.gmra.mrb[20].mxu0 %v1770_v15  ;;  %994 = vmatmul.mubr.bf16.gmra.mrb[20].mxu1 %v1777_v1  ;;  %v413_v15 = vadd.f32 %v1640_v24, %v357_v23  ;;  %v303_v1 = vmul.f32 %v1622_v43, %v2089_v33  ;;  %v461_v16 = vmax.f32 %v412_v26, 0.0  ;;  %v438_v47 = vadd.f32 %v1640_v24, %v382_v50 }
 0x128   :  { %945 = vmatprep.mubr.msk.bf16.mxu0 %vm1050_vm0, %v2085_v60  ;;  %997 = vmatprep.mubr.msk.bf16.mxu1 %vm1050_vm0, %v2085_v60  ;;  %v358_v25 = vmul.f32 %v1627_v45, %v302_v54  ;;  %v511_v29 = vpack.c.bf16 %v486_v22, %v485_v46  ;;  %v507_v43 = vpack.c.bf16 %v478_v55, %v477_v51  ;;  %v454_v48 = vmax.f32 %v1808_v2, 0.0 }
 0x129   :  { %v462_v56 = vmax.f32 %v413_v15, 0.0  ;;  %v359_v35 = vmul.f32 %v1627_v45, %v303_v1  ;;  %v431_v37 = vadd.f32 %v1640_v24, %v1819_v14  ;;  %v453_v45 = vmax.f32 %v1782_v28, 0.0 }
 0x12a   :  { %v414_v49 = vadd.f32 %v1640_v24, %v358_v25  ;;  %v479_v6 = vmax.f32 %v430_v34, 0.0 }
 0x12b   :  { %v499_v57 = vpack.c.bf16 %v462_v56, %v461_v16  ;;  %v415_v4 = vadd.f32 %v1640_v24, %v359_v35  ;;  %v480_v51 = vmax.f32 %v431_v37, 0.0  ;;  %v495_v55 = vpack.c.bf16 %v454_v48, %v453_v45 }
 0x12c   :  { %v463_v39 = vmax.f32 %v414_v49, 0.0  ;;  %v487_v24 = vmax.f32 %v438_v47, 0.0 }
 0x12d   :  { %v464_v17 = vmax.f32 %v415_v4, 0.0  ;;  %v508_v14 = vpack.c.bf16 %v480_v51, %v479_v6 }
 0x12e   :  { %v512_v28 = vpack.c.bf16 %v487_v24, %v487_v24 }
 0x12f   :  { %946 = vmatmul.mubr.bf16.gmra.mrb[24].mxu0 %v494_v30  ;;  %998 = vmatmul.mubr.bf16.gmra.mrb[24].mxu1 %v507_v43  ;;  %v500_v41 = vpack.c.bf16 %v464_v17, %v463_v39 }
 0x130   :  { %949 = vmatprep.mubr.msk.bf16.mxu0 %vm1050_vm0, %v2085_v60  ;;  %1001 = vmatprep.mubr.msk.bf16.mxu1 %vm1050_vm0, %v2085_v60 }
 0x137   :  { %950 = vmatmul.mubr.bf16.gmra.mrb[28].mxu0 %v495_v55  ;;  %1002 = vmatmul.mubr.bf16.gmra.mrb[28].mxu1 %v508_v14 }
 0x138   :  { %953 = vmatprep.mubr.msk.bf16.mxu0 %vm1050_vm0, %v2085_v60  ;;  %1005 = vmatprep.mubr.msk.bf16.mxu1 %vm1050_vm0, %v2085_v60 }
 0x13f   :  { %954 = vmatmul.mubr.bf16.gmra.mrb[32].mxu0 %v1835_v40  ;;  %1006 = vmatmul.mubr.bf16.gmra.mrb[32].mxu1 %v1839_v58 }
 0x140   :  { %957 = vmatprep.mubr.msk.bf16.mxu0 %vm1050_vm0, %v2085_v60  ;;  %1009 = vmatprep.mubr.msk.bf16.mxu1 %vm1050_vm0, %v2085_v60 }
 0x147   :  { %958 = vmatmul.mubr.bf16.gmra.mrb[36].mxu0 %v1849_v61  ;;  %1010 = vmatmul.mubr.bf16.gmra.mrb[36].mxu1 %v510_v32 }
 0x148   :  { %961 = vmatprep.mubr.msk.bf16.mxu0 %vm1050_vm0, %v2085_v60  ;;  %1013 = vmatprep.mubr.msk.bf16.mxu1 %vm1050_vm0, %v2085_v60 }
 0x14f   :  { %962 = vmatmul.mubr.bf16.gmra.mrb[40].mxu0 %v498_v11  ;;  %1014 = vmatmul.mubr.bf16.gmra.mrb[40].mxu1 %v511_v29 }
 0x150   :  { %965 = vmatprep.mubr.msk.bf16.mxu0 %vm1050_vm0, %v2085_v60  ;;  %1017 = vmatprep.mubr.msk.bf16.mxu1 %vm1050_vm0, %v2085_v60 }
 0x157   :  { %966 = vmatmul.mubr.bf16.gmra.mrb[44].mxu0 %v499_v57  ;;  %1018 = vmatmul.mubr.bf16.gmra.mrb[44].mxu1 %v512_v28 }
 0x158   :  { %969 = vmatprep.mubr.msk.bf16.mxu0 %vm1050_vm0, %v2085_v60 }
 0x15f   :  { %970 = vmatmul.mubr.bf16.gmra.mrb[48].mxu0 %v500_v41 }
 0x1d2   :  { %v611_v2 = vpop.f32.mrb[0].mxu0  ;;  %v715_v40 = vpop.f32.mrb[0].mxu1 }
 0x1d3   :  { %809 = vst [vmem:[%s2074_s4] sm:$0xff] %v611_v2  ;;  %v923_v58 = vpop.f32.mrb[1].mxu0  ;;  %835 = vst [vmem:[%s2074_s4 + $0xd0] sm:$0xff] %v715_v40  ;;  %v975_v44 = vpop.f32.mrb[1].mxu1 }
 0x1d4   :  { %v614_v62 = vpop.f32.mrb[2].mxu0  ;;  %v718_v19 = vpop.f32.mrb[2].mxu1 }
 0x1d5   :  { %810 = vst [vmem:[%s2074_s4 + $0x8] sm:$0xff] %v614_v62  ;;  %v924_v60 = vpop.f32.mrb[3].mxu0  ;;  %836 = vst [vmem:[%s2074_s4 + $0xd8] sm:$0xff] %v718_v19  ;;  %v976_v3 = vpop.f32.mrb[3].mxu1 }
 0x1da   :  { %v619_v10 = vpop.f32.mrb[4].mxu0  ;;  %v723_v13 = vpop.f32.mrb[4].mxu1 }
 0x1db   :  { %811 = vst [vmem:[%s2074_s4 + $0x10] sm:$0xff] %v619_v10  ;;  %v927_v8 = vpop.f32.mrb[5].mxu0  ;;  %837 = vst [vmem:[%s2074_s4 + $0xe0] sm:$0xff] %v723_v13  ;;  %v979_v61 = vpop.f32.mrb[5].mxu1 }
 0x1dc   :  { %v622_v63 = vpop.f32.mrb[6].mxu0  ;;  %v726_v12 = vpop.f32.mrb[6].mxu1 }
 0x1dd   :  { %812 = vst [vmem:[%s2074_s4 + $0x18] sm:$0xff] %v622_v63  ;;  %v928_v52 = vpop.f32.mrb[7].mxu0  ;;  %838 = vst [vmem:[%s2074_s4 + $0xe8] sm:$0xff] %v726_v12  ;;  %v980_v21 = vpop.f32.mrb[7].mxu1 }
 0x1e2   :  { %v627_v9 = vpop.f32.mrb[8].mxu0  ;;  %v731_v5 = vpop.f32.mrb[8].mxu1 }
 0x1e3   :  { %813 = vst [vmem:[%s2074_s4 + $0x20] sm:$0xff] %v627_v9  ;;  %v931_v59 = vpop.f32.mrb[9].mxu0  ;;  %839 = vst [vmem:[%s2074_s4 + $0xf0] sm:$0xff] %v731_v5  ;;  %v983_v18 = vpop.f32.mrb[9].mxu1 }
 0x1e4   :  { %v630_v38 = vpop.f32.mrb[10].mxu0  ;;  %v734_v53 = vpop.f32.mrb[10].mxu1 }
 0x1e5   :  { %814 = vst [vmem:[%s2074_s4 + $0x28] sm:$0xff] %v630_v38  ;;  %v932_v42 = vpop.f32.mrb[11].mxu0  ;;  %840 = vst [vmem:[%s2074_s4 + $0xf8] sm:$0xff] %v734_v53  ;;  %v984_v20 = vpop.f32.mrb[11].mxu1 }
 0x1ea   :  { %v635_v36 = vpop.f32.mrb[12].mxu0  ;;  %v739_v32 = vpop.f32.mrb[12].mxu1 }
 0x1eb   :  { %815 = vst [vmem:[%s2074_s4 + $0x30] sm:$0xff] %v635_v36  ;;  %v935_v0 = vpop.f32.mrb[13].mxu0  ;;  %841 = vst [vmem:[%s2074_s4 + $0x100] sm:$0xff] %v739_v32  ;;  %v987_v31 = vpop.f32.mrb[13].mxu1 }
 0x1ec   :  { %v638_v23 = vpop.f32.mrb[14].mxu0  ;;  %v742_v27 = vpop.f32.mrb[14].mxu1 }
 0x1ed   :  { %816 = vst [vmem:[%s2074_s4 + $0x38] sm:$0xff] %v638_v23  ;;  %v936_v26 = vpop.f32.mrb[15].mxu0  ;;  %842 = vst [vmem:[%s2074_s4 + $0x108] sm:$0xff] %v742_v27  ;;  %v988_v50 = vpop.f32.mrb[15].mxu1 }
 0x1f2   :  { %v643_v7 = vpop.f32.mrb[16].mxu0  ;;  %v747_v54 = vpop.f32.mrb[16].mxu1 }
 0x1f3   :  { %817 = vst [vmem:[%s2074_s4 + $0x40] sm:$0xff] %v643_v7  ;;  %v939_v46 = vpop.f32.mrb[17].mxu0  ;;  %843 = vst [vmem:[%s2074_s4 + $0x110] sm:$0xff] %v747_v54  ;;  %v991_v22 = vpop.f32.mrb[17].mxu1 }
 0x1f4   :  { %v646_v15 = vpop.f32.mrb[18].mxu0  ;;  %v750_v33 = vpop.f32.mrb[18].mxu1 }
 0x1f5   :  { %818 = vst [vmem:[%s2074_s4 + $0x48] sm:$0xff] %v646_v15  ;;  %v940_v1 = vpop.f32.mrb[19].mxu0  ;;  %844 = vst [vmem:[%s2074_s4 + $0x118] sm:$0xff] %v750_v33  ;;  %v992_v11 = vpop.f32.mrb[19].mxu1 }
 0x1fa   :  { %v651_v16 = vpop.f32.mrb[20].mxu0  ;;  %v755_v47 = vpop.f32.mrb[20].mxu1 }
 0x1fb   :  { %819 = vst [vmem:[%s2074_s4 + $0x50] sm:$0xff] %v651_v16  ;;  %v943_v25 = vpop.f32.mrb[21].mxu0  ;;  %845 = vst [vmem:[%s2074_s4 + $0x120] sm:$0xff] %v755_v47  ;;  %v995_v30 = vpop.f32.mrb[21].mxu1 }
 0x1fc   :  { %v654_v29 = vpop.f32.mrb[22].mxu0  ;;  %v758_v56 = vpop.f32.mrb[22].mxu1 }
 0x1fd   :  { %820 = vst [vmem:[%s2074_s4 + $0x58] sm:$0xff] %v654_v29  ;;  %v944_v35 = vpop.f32.mrb[23].mxu0  ;;  %846 = vst [vmem:[%s2074_s4 + $0x128] sm:$0xff] %v758_v56  ;;  %v996_v43 = vpop.f32.mrb[23].mxu1 }
 0x202   :  { %v659_v34 = vpop.f32.mrb[24].mxu0  ;;  %v763_v37 = vpop.f32.mrb[24].mxu1 }
 0x203   :  { %821 = vst [vmem:[%s2074_s4 + $0x60] sm:$0xff] %v659_v34  ;;  %v947_v49 = vpop.f32.mrb[25].mxu0  ;;  %847 = vst [vmem:[%s2074_s4 + $0x130] sm:$0xff] %v763_v37  ;;  %v999_v57 = vpop.f32.mrb[25].mxu1 }
 0x204   :  { %v662_v4 = vpop.f32.mrb[26].mxu0  ;;  %v766_v39 = vpop.f32.mrb[26].mxu1 }
 0x205   :  { %822 = vst [vmem:[%s2074_s4 + $0x68] sm:$0xff] %v662_v4  ;;  %v948_v17 = vpop.f32.mrb[27].mxu0  ;;  %848 = vst [vmem:[%s2074_s4 + $0x138] sm:$0xff] %v766_v39  ;;  %v1000_v45 = vpop.f32.mrb[27].mxu1 }
 0x20a   :  { %v667_v48 = vpop.f32.mrb[28].mxu0  ;;  %v771_v6 = vpop.f32.mrb[28].mxu1 }
 0x20b   :  { %823 = vst [vmem:[%s2074_s4 + $0x70] sm:$0xff] %v667_v48  ;;  %v951_v51 = vpop.f32.mrb[29].mxu0  ;;  %849 = vst [vmem:[%s2074_s4 + $0x140] sm:$0xff] %v771_v6  ;;  %v1003_v41 = vpop.f32.mrb[29].mxu1 }
 0x20c   :  { %v670_v55 = vpop.f32.mrb[30].mxu0  ;;  %v774_v14 = vpop.f32.mrb[30].mxu1 }
 0x20d   :  { %824 = vst [vmem:[%s2074_s4 + $0x78] sm:$0xff] %v670_v55  ;;  %v952_v24 = vpop.f32.mrb[31].mxu0  ;;  %850 = vst [vmem:[%s2074_s4 + $0x148] sm:$0xff] %v774_v14  ;;  %v1004_v28 = vpop.f32.mrb[31].mxu1 }
 0x212   :  { %v675_v2 = vpop.f32.mrb[32].mxu0  ;;  %v779_v40 = vpop.f32.mrb[32].mxu1 }
 0x213   :  { %825 = vst [vmem:[%s2074_s4 + $0x80] sm:$0xff] %v675_v2  ;;  %v955_v58 = vpop.f32.mrb[33].mxu0  ;;  %851 = vst [vmem:[%s2074_s4 + $0x150] sm:$0xff] %v779_v40  ;;  %v1007_v44 = vpop.f32.mrb[33].mxu1 }
 0x214   :  { %v678_v62 = vpop.f32.mrb[34].mxu0  ;;  %v782_v19 = vpop.f32.mrb[34].mxu1 }
 0x215   :  { %826 = vst [vmem:[%s2074_s4 + $0x88] sm:$0xff] %v678_v62  ;;  %v956_v60 = vpop.f32.mrb[35].mxu0  ;;  %852 = vst [vmem:[%s2074_s4 + $0x158] sm:$0xff] %v782_v19  ;;  %v1008_v3 = vpop.f32.mrb[35].mxu1 }
 0x21a   :  { %v683_v10 = vpop.f32.mrb[36].mxu0  ;;  %v787_v13 = vpop.f32.mrb[36].mxu1 }
 0x21b   :  { %827 = vst [vmem:[%s2074_s4 + $0x90] sm:$0xff] %v683_v10  ;;  %v959_v8 = vpop.f32.mrb[37].mxu0  ;;  %853 = vst [vmem:[%s2074_s4 + $0x160] sm:$0xff] %v787_v13  ;;  %v1011_v61 = vpop.f32.mrb[37].mxu1 }
 0x21c   :  { %v686_v63 = vpop.f32.mrb[38].mxu0  ;;  %v790_v12 = vpop.f32.mrb[38].mxu1 }
 0x21d   :  { %828 = vst [vmem:[%s2074_s4 + $0x98] sm:$0xff] %v686_v63  ;;  %v960_v52 = vpop.f32.mrb[39].mxu0  ;;  %854 = vst [vmem:[%s2074_s4 + $0x168] sm:$0xff] %v790_v12  ;;  %v1012_v21 = vpop.f32.mrb[39].mxu1 }
 0x222   :  { %v691_v9 = vpop.f32.mrb[40].mxu0  ;;  %v795_v5 = vpop.f32.mrb[40].mxu1 }
 0x223   :  { %829 = vst [vmem:[%s2074_s4 + $0xa0] sm:$0xff] %v691_v9  ;;  %v963_v59 = vpop.f32.mrb[41].mxu0  ;;  %855 = vst [vmem:[%s2074_s4 + $0x170] sm:$0xff] %v795_v5  ;;  %v1015_v18 = vpop.f32.mrb[41].mxu1 }
 0x224   :  { %v694_v38 = vpop.f32.mrb[42].mxu0  ;;  %v798_v53 = vpop.f32.mrb[42].mxu1 }
 0x225   :  { %830 = vst [vmem:[%s2074_s4 + $0xa8] sm:$0xff] %v694_v38  ;;  %v964_v42 = vpop.f32.mrb[43].mxu0  ;;  %856 = vst [vmem:[%s2074_s4 + $0x178] sm:$0xff] %v798_v53  ;;  %v1016_v20 = vpop.f32.mrb[43].mxu1 }
 0x22a   :  { %v699_v36 = vpop.f32.mrb[44].mxu0  ;;  %v803_v32 = vpop.f32.mrb[44].mxu1 }
 0x22b   :  { %831 = vst [vmem:[%s2074_s4 + $0xb0] sm:$0xff] %v699_v36  ;;  %v967_v0 = vpop.f32.mrb[45].mxu0  ;;  %857 = vst [vmem:[%s2074_s4 + $0x180] sm:$0xff] %v803_v32  ;;  %v1019_v31 = vpop.f32.mrb[45].mxu1 }
 0x22c   :  { %v702_v23 = vpop.f32.mrb[46].mxu0  ;;  %v806_v27 = vpop.f32.mrb[46].mxu1 }
 0x22d   :  { %832 = vst [vmem:[%s2074_s4 + $0xb8] sm:$0xff] %v702_v23  ;;  %v968_v26 = vpop.f32.mrb[47].mxu0  ;;  %v1020_v50 = vpop.f32.mrb[47].mxu1 }
 0x232   :  { %v707_v7 = vpop.f32.mrb[48].mxu0 }
 0x233   :  { %833 = vst [vmem:[%s2074_s4 + $0xc0] sm:$0xff] %v707_v7  ;;  %v971_v54 = vpop.f32.mrb[49].mxu0 }
 0x234   :  { %v710_v46 = vpop.f32.mrb[50].mxu0 }
 0x235   :  { %834 = vst [vmem:[%s2074_s4 + $0xc8] sm:$0xff] %v710_v46  ;;  %v972_v22 = vpop.f32.mrb[51].mxu0 }

</bundles_post_ra>
